<compile_context>
chip_gen: v7x
topology: tpu7x:2x2x1
jax: 0.10.0
libtpu: 0.0.40
codegen_flags: <defaults>
</compile_context>

<pallas_src>
import functools

import jax
import jax.numpy as jnp
from jax.experimental import pallas as pl
from jax.experimental.pallas import tpu as pltpu


# ----------------------------------------------------------------------------
# Fused kernel: lidar_compress_net + LSTM + head
# ----------------------------------------------------------------------------
def actor_fused_kernel(
    # inputs
    lidar_ref, pos_ref, h0_ref, c0_ref,
    w1_ref, b1_ref, w2_ref, b2_ref, w3_ref, b3_ref,
    wxf_ref, wxp_ref, wh_ref, bl_ref,
    lw2_ref, lb2_ref, lw3_ref, lb3_ref,
    scale_ref, abias_ref,
    # outputs
    a_out_ref, h_out_ref, c_out_ref,
    # scratch
    pre_scratch, hs_scratch,
    *, B, T, H):
    f32 = jnp.float32

    # --- lidar_compress_net on the whole (B*T, L) slab -----------------------
    x = lidar_ref[...]
    h1 = jnp.maximum(jnp.dot(x, w1_ref[...], preferred_element_type=f32) + b1_ref[...], 0.0)
    h2 = jnp.maximum(jnp.dot(h1, w2_ref[...], preferred_element_type=f32) + b2_ref[...], 0.0)
    feat = jnp.dot(h2, w3_ref[...], preferred_element_type=f32) + b3_ref[...]      # (B*T, F)

    # --- hoisted LSTM input projection for ALL timesteps ----------------------
    # concat(feat, pos) @ W_ih  ==  feat @ Wxf + pos @ Wxp   (weights pre-split)
    pre = (jnp.dot(feat, wxf_ref[...], preferred_element_type=f32)
           + jnp.dot(pos_ref[...], wxp_ref[...], preferred_element_type=f32)
           + bl_ref[...])                                                          # (B*T, 4H)
    pre_scratch[...] = pre.reshape(B, T, 4 * H)

    # --- serial recurrence: only h @ Wh + elementwise gates on the chain ------
    h = h0_ref[...]          # (B, H)
    c = c0_ref[...]          # (B, H)
    wh = wh_ref[...]         # (H, 4H)
    for t in range(T):       # T is static -> fully unrolled, all indices static
        gates = pre_scratch[:, t, :] + jnp.dot(h, wh, preferred_element_type=f32)  # (B, 4H)
        sig = jax.nn.sigmoid(gates)   # full-width EUP op
        th = jnp.tanh(gates)          # full-width EUP op
        i_g = sig[:, 0 * H:1 * H]
        f_g = sig[:, 1 * H:2 * H]
        g_g = th[:, 2 * H:3 * H]
        o_g = sig[:, 3 * H:4 * H]
        c = f_g * c + i_g * g_g
        h = o_g * jnp.tanh(c)
        hs_scratch[:, t, :] = h

    h_out_ref[...] = h
    c_out_ref[...] = c

    # --- action head, batched over all timesteps ------------------------------
    hs = hs_scratch[...].reshape(B * T, H)
    z = jnp.maximum(jnp.dot(hs, lw2_ref[...], preferred_element_type=f32) + lb2_ref[...], 0.0)
    a = jnp.tanh(jnp.dot(z, lw3_ref[...], preferred_element_type=f32) + lb3_ref[...])
    a_out_ref[...] = a * scale_ref[...] + abias_ref[...]                            # (B*T, A)


# ----------------------------------------------------------------------------
# Wrapper
# ----------------------------------------------------------------------------
_VMEM = pl.BlockSpec(memory_space=pltpu.MemorySpace.VMEM)


@jax.jit
def actor_forward(lidar_state, position_robot_state, h0, c0, params):
    B, T, L = lidar_state.shape
    P = position_robot_state.shape[-1]
    H = h0.shape[-1]
    A = params["lw3"].shape[-1]

    # free reshapes only (no XLA transposes anywhere in the wrapper)
    lidar_flat = lidar_state.reshape(B * T, L)
    pos_flat = position_robot_state.reshape(B * T, P)

    kernel = functools.partial(actor_fused_kernel, B=B, T=T, H=H)

    a_flat, h_n, c_n = pl.pallas_call(
        kernel,
        out_shape=(jax.ShapeDtypeStruct((B * T, A), jnp.float32),
                   jax.ShapeDtypeStruct((B, H), jnp.float32),
                   jax.ShapeDtypeStruct((B, H), jnp.float32)),
        in_specs=[_VMEM] * 20,
        out_specs=(_VMEM, _VMEM, _VMEM),
        scratch_shapes=[pltpu.VMEM((B, T, 4 * H), jnp.float32),   # hoisted input projections
                        pltpu.VMEM((B, T, H), jnp.float32)],      # per-step hidden states
    )(lidar_flat, pos_flat, h0.reshape(B, H), c0.reshape(B, H),
      params["w1"], params["b1"], params["w2"], params["b2"], params["w3"], params["b3"],
      params["wxf"], params["wxp"], params["wh"], params["b_lstm"],
      params["lw2"], params["lb2"], params["lw3"], params["lb3"],
      params["scale"], params["abias"])

    a = a_flat.reshape(B, T, A)
    return a, (h_n.reshape(1, B, H), c_n.reshape(1, B, H))


# ----------------------------------------------------------------------------
# Pure-JAX reference (for correctness check only)
# ----------------------------------------------------------------------------
def actor_reference(lidar_state, position_robot_state, h0, c0, params):
    h = jnp.maximum(lidar_state @ params["w1"] + params["b1"], 0.0)
    h = jnp.maximum(h @ params["w2"] + params["b2"], 0.0)
    feat = h @ params["w3"] + params["b3"]

    B, T, _ = lidar_state.shape
    H = h0.shape[-1]
    hh = h0.reshape(B, H)
    cc = c0.reshape(B, H)
    outs = []
    for t in range(T):
        gates = (feat[:, t, :] @ params["wxf"]
                 + position_robot_state[:, t, :] @ params["wxp"]
                 + hh @ params["wh"] + params["b_lstm"])
        i_g = jax.nn.sigmoid(gates[:, 0 * H:1 * H])
        f_g = jax.nn.sigmoid(gates[:, 1 * H:2 * H])
        g_g = jnp.tanh(gates[:, 2 * H:3 * H])
        o_g = jax.nn.sigmoid(gates[:, 3 * H:4 * H])
        cc = f_g * cc + i_g * g_g
        hh = o_g * jnp.tanh(cc)
        a = jnp.maximum(hh @ params["lw2"] + params["lb2"], 0.0)
        a = jnp.tanh(a @ params["lw3"] + params["lb3"])
        outs.append(a * params["scale"] + params["abias"])
    a = jnp.stack(outs, axis=1)
    return a, (hh.reshape(1, B, H), cc.reshape(1, B, H))


if __name__ == "__main__":
    # ---- small, deterministic problem sizes ---------------------------------
    B, T = 2, 8
    lidar_state_dim = 32
    robot_goal_state_dim = 4
    lidar_feature_dim = 16
    hidden_dim = 32
    action_dim = 2
    action_low = jnp.array([-1.0, -0.5], dtype=jnp.float32)
    action_high = jnp.array([1.0, 1.5], dtype=jnp.float32)

    key = jax.random.PRNGKey(0)
    ks = jax.random.split(key, 16)

    def init(k, shape, scale=0.1):
        return (scale * jax.random.normal(k, shape)).astype(jnp.float32)

    # weights stored as (in, out) == W^T of the corresponding nn.Linear
    params = {
        # lidar_compress_net
        "w1": init(ks[0], (lidar_state_dim, hidden_dim)),
        "b1": init(ks[1], (1, hidden_dim)),
        "w2": init(ks[2], (hidden_dim, hidden_dim)),
        "b2": init(ks[3], (1, hidden_dim)),
        "w3": init(ks[4], (hidden_dim, lidar_feature_dim)),
        "b3": init(ks[5], (1, lidar_feature_dim)),
        # LSTM (input weight split: feature part / position part), gate order i,f,g,o
        "wxf": init(ks[6], (lidar_feature_dim, 4 * hidden_dim)),
        "wxp": init(ks[7], (robot_goal_state_dim, 4 * hidden_dim)),
        "wh": init(ks[8], (hidden_dim, 4 * hidden_dim)),
        "b_lstm": init(ks[9], (1, 4 * hidden_dim)),   # b_ih + b_hh combined
        # l2 / l3
        "lw2": init(ks[10], (hidden_dim, hidden_dim)),
        "lb2": init(ks[11], (1, hidden_dim)),
        "lw3": init(ks[12], (hidden_dim, action_dim)),
        "lb3": init(ks[13], (1, action_dim)),
        # action rescaling
        "scale": ((action_high - action_low) / 2.0).reshape(1, action_dim),
        "abias": ((action_high + action_low) / 2.0).reshape(1, action_dim),
    }

    # example inputs
    ki = jax.random.split(ks[14], 4)
    lidar_state = jax.random.normal(ki[0], (B, T, lidar_state_dim), dtype=jnp.float32)
    position_robot_state = jax.random.normal(
        ki[1], (B, T, robot_goal_state_dim), dtype=jnp.float32)
    h0 = jax.random.normal(ki[2], (1, B, hidden_dim), dtype=jnp.float32)
    c0 = jax.random.normal(ki[3], (1, B, hidden_dim), dtype=jnp.float32)

    a, (h_n, c_n) = actor_forward(lidar_state, position_robot_state, h0, c0, params)
    jax.block_until_ready((a, h_n, c_n))

    a_ref, (h_ref, c_ref) = actor_reference(
        lidar_state, position_robot_state, h0, c0, params)
    assert a.shape == (B, T, action_dim)
    assert h_n.shape == (1, B, hidden_dim) and c_n.shape == (1, B, hidden_dim)
    assert jnp.allclose(a, a_ref, atol=1e-3, rtol=1e-3)
    assert jnp.allclose(h_n, h_ref, atol=1e-3, rtol=1e-3)
    assert jnp.allclose(c_n, c_ref, atol=1e-3, rtol=1e-3)

    print("KERNEL_OK")
</pallas_src>

<mosaic_0001>
module attributes {stable_mosaic.version = 11 : i64} {
  func.func @actor_fused_kernel(%arg0: memref<16x32xf32, #tpu.memory_space<vmem>>, %arg1: memref<16x4xf32, #tpu.memory_space<vmem>>, %arg2: memref<2x32xf32, #tpu.memory_space<vmem>>, %arg3: memref<2x32xf32, #tpu.memory_space<vmem>>, %arg4: memref<32x32xf32, #tpu.memory_space<vmem>>, %arg5: memref<1x32xf32, #tpu.memory_space<vmem>>, %arg6: memref<32x32xf32, #tpu.memory_space<vmem>>, %arg7: memref<1x32xf32, #tpu.memory_space<vmem>>, %arg8: memref<32x16xf32, #tpu.memory_space<vmem>>, %arg9: memref<1x16xf32, #tpu.memory_space<vmem>>, %arg10: memref<16x128xf32, #tpu.memory_space<vmem>>, %arg11: memref<4x128xf32, #tpu.memory_space<vmem>>, %arg12: memref<32x128xf32, #tpu.memory_space<vmem>>, %arg13: memref<1x128xf32, #tpu.memory_space<vmem>>, %arg14: memref<32x32xf32, #tpu.memory_space<vmem>>, %arg15: memref<1x32xf32, #tpu.memory_space<vmem>>, %arg16: memref<32x2xf32, #tpu.memory_space<vmem>>, %arg17: memref<1x2xf32, #tpu.memory_space<vmem>>, %arg18: memref<1x2xf32, #tpu.memory_space<vmem>>, %arg19: memref<1x2xf32, #tpu.memory_space<vmem>>, %arg20: memref<16x2xf32, #tpu.memory_space<vmem>>, %arg21: memref<2x32xf32, #tpu.memory_space<vmem>>, %arg22: memref<2x32xf32, #tpu.memory_space<vmem>>, %arg23: memref<2x8x128xf32, #tpu.memory_space<vmem>>, %arg24: memref<2x8x32xf32, #tpu.memory_space<vmem>>) attributes {dimension_semantics = [], scalar_prefetch = 0 : i64, scratch_operands = 2 : i64, tpu.core_type = #tpu.core_type<tc>} {
    %c0 = arith.constant 0 : index
    %c0_0 = arith.constant 0 : index
    %0 = vector.load %arg0[%c0, %c0_0] : memref<16x32xf32, #tpu.memory_space<vmem>>, vector<16x32xf32>
    %c0_1 = arith.constant 0 : index
    %c0_2 = arith.constant 0 : index
    %1 = vector.load %arg4[%c0_1, %c0_2] : memref<32x32xf32, #tpu.memory_space<vmem>>, vector<32x32xf32>
    %cst = arith.constant dense<0.000000e+00> : vector<16x32xf32>
    %2 = tpu.matmul %0, %1, %cst {dimension_numbers = #tpu.dot_dimension_numbers<[1], [0], [0], [1], [0, 0, 1, 1], [], []>} : vector<16x32xf32>, vector<32x32xf32>, vector<16x32xf32> -> vector<16x32xf32>
    %c0_3 = arith.constant 0 : index
    %c0_4 = arith.constant 0 : index
    %3 = vector.load %arg5[%c0_3, %c0_4] : memref<1x32xf32, #tpu.memory_space<vmem>>, vector<1x32xf32>
    %4 = vector.broadcast %3 : vector<1x32xf32> to vector<16x32xf32>
    %5 = arith.addf %2, %4 : vector<16x32xf32>
    %cst_5 = arith.constant 0.000000e+00 : f32
    %6 = vector.broadcast %cst_5 : f32 to vector<16x32xf32>
    %7 = arith.maximumf %5, %6 : vector<16x32xf32>
    %c0_6 = arith.constant 0 : index
    %c0_7 = arith.constant 0 : index
    %8 = vector.load %arg6[%c0_6, %c0_7] : memref<32x32xf32, #tpu.memory_space<vmem>>, vector<32x32xf32>
    %cst_8 = arith.constant dense<0.000000e+00> : vector<16x32xf32>
    %9 = tpu.matmul %7, %8, %cst_8 {dimension_numbers = #tpu.dot_dimension_numbers<[1], [0], [0], [1], [0, 0, 1, 1], [], []>} : vector<16x32xf32>, vector<32x32xf32>, vector<16x32xf32> -> vector<16x32xf32>
    %c0_9 = arith.constant 0 : index
    %c0_10 = arith.constant 0 : index
    %10 = vector.load %arg7[%c0_9, %c0_10] : memref<1x32xf32, #tpu.memory_space<vmem>>, vector<1x32xf32>
    %11 = vector.broadcast %10 : vector<1x32xf32> to vector<16x32xf32>
    %12 = arith.addf %9, %11 : vector<16x32xf32>
    %cst_11 = arith.constant 0.000000e+00 : f32
    %13 = vector.broadcast %cst_11 : f32 to vector<16x32xf32>
    %14 = arith.maximumf %12, %13 : vector<16x32xf32>
    %c0_12 = arith.constant 0 : index
    %c0_13 = arith.constant 0 : index
    %15 = vector.load %arg8[%c0_12, %c0_13] : memref<32x16xf32, #tpu.memory_space<vmem>>, vector<32x16xf32>
    %cst_14 = arith.constant dense<0.000000e+00> : vector<16x16xf32>
    %16 = tpu.matmul %14, %15, %cst_14 {dimension_numbers = #tpu.dot_dimension_numbers<[1], [0], [0], [1], [0, 0, 1, 1], [], []>} : vector<16x32xf32>, vector<32x16xf32>, vector<16x16xf32> -> vector<16x16xf32>
    %c0_15 = arith.constant 0 : index
    %c0_16 = arith.constant 0 : index
    %17 = vector.load %arg9[%c0_15, %c0_16] : memref<1x16xf32, #tpu.memory_space<vmem>>, vector<1x16xf32>
    %18 = vector.broadcast %17 : vector<1x16xf32> to vector<16x16xf32>
    %19 = arith.addf %16, %18 : vector<16x16xf32>
    %c0_17 = arith.constant 0 : index
    %c0_18 = arith.constant 0 : index
    %20 = vector.load %arg10[%c0_17, %c0_18] : memref<16x128xf32, #tpu.memory_space<vmem>>, vector<16x128xf32>
    %cst_19 = arith.constant dense<0.000000e+00> : vector<16x128xf32>
    %21 = tpu.matmul %19, %20, %cst_19 {dimension_numbers = #tpu.dot_dimension_numbers<[1], [0], [0], [1], [0, 0, 1, 1], [], []>} : vector<16x16xf32>, vector<16x128xf32>, vector<16x128xf32> -> vector<16x128xf32>
    %c0_20 = arith.constant 0 : index
    %c0_21 = arith.constant 0 : index
    %22 = vector.load %arg1[%c0_20, %c0_21] : memref<16x4xf32, #tpu.memory_space<vmem>>, vector<16x4xf32>
    %c0_22 = arith.constant 0 : index
    %c0_23 = arith.constant 0 : index
    %23 = vector.load %arg11[%c0_22, %c0_23] : memref<4x128xf32, #tpu.memory_space<vmem>>, vector<4x128xf32>
    %cst_24 = arith.constant dense<0.000000e+00> : vector<16x128xf32>
    %24 = tpu.matmul %22, %23, %cst_24 {dimension_numbers = #tpu.dot_dimension_numbers<[1], [0], [0], [1], [0, 0, 1, 1], [], []>} : vector<16x4xf32>, vector<4x128xf32>, vector<16x128xf32> -> vector<16x128xf32>
    %25 = arith.addf %21, %24 : vector<16x128xf32>
    %c0_25 = arith.constant 0 : index
    %c0_26 = arith.constant 0 : index
    %26 = vector.load %arg13[%c0_25, %c0_26] : memref<1x128xf32, #tpu.memory_space<vmem>>, vector<1x128xf32>
    %27 = vector.broadcast %26 : vector<1x128xf32> to vector<16x128xf32>
    %28 = arith.addf %25, %27 : vector<16x128xf32>
    %29 = vector.shape_cast %28 : vector<16x128xf32> to vector<2x8x128xf32>
    %c0_27 = arith.constant 0 : index
    %c0_28 = arith.constant 0 : index
    %c0_29 = arith.constant 0 : index
    %30 = vector.load %arg23[%c0_27, %c0_28, %c0_29] : memref<2x8x128xf32, #tpu.memory_space<vmem>>, vector<2x8x128xf32>
    tpu.vector_store %arg23[%c0_27, %c0_28, %c0_29], %29 {strides = array<i32>} : memref<2x8x128xf32, #tpu.memory_space<vmem>>, vector<2x8x128xf32>,
    %c0_30 = arith.constant 0 : index
    %c0_31 = arith.constant 0 : index
    %31 = vector.load %arg2[%c0_30, %c0_31] : memref<2x32xf32, #tpu.memory_space<vmem>>, vector<2x32xf32>
    %c0_32 = arith.constant 0 : index
    %c0_33 = arith.constant 0 : index
    %32 = vector.load %arg3[%c0_32, %c0_33] : memref<2x32xf32, #tpu.memory_space<vmem>>, vector<2x32xf32>
    %c0_34 = arith.constant 0 : index
    %c0_35 = arith.constant 0 : index
    %33 = vector.load %arg12[%c0_34, %c0_35] : memref<32x128xf32, #tpu.memory_space<vmem>>, vector<32x128xf32>
    %c0_36 = arith.constant 0 : index
    %c0_37 = arith.constant 0 : index
    %c0_38 = arith.constant 0 : index
    %34 = vector.load %arg23[%c0_36, %c0_37, %c0_38] : memref<2x8x128xf32, #tpu.memory_space<vmem>>, vector<2x1x128xf32>
    %35 = vector.shape_cast %34 : vector<2x1x128xf32> to vector<2x128xf32>
    %cst_39 = arith.constant dense<0.000000e+00> : vector<2x128xf32>
    %36 = tpu.matmul %31, %33, %cst_39 {dimension_numbers = #tpu.dot_dimension_numbers<[1], [0], [0], [1], [0, 0, 1, 1], [], []>} : vector<2x32xf32>, vector<32x128xf32>, vector<2x128xf32> -> vector<2x128xf32>
    %37 = arith.addf %35, %36 : vector<2x128xf32>
    %38 = arith.negf %37 : vector<2x128xf32>
    %39 = math.exp %38 : vector<2x128xf32>
    %cst_40 = arith.constant 1.000000e+00 : f32
    %40 = vector.broadcast %cst_40 : f32 to vector<2x128xf32>
    %41 = arith.addf %40, %39 : vector<2x128xf32>
    %42 = arith.divf %40, %41 : vector<2x128xf32>
    %43 = math.tanh %37 : vector<2x128xf32>
    %44 = vector.extract_strided_slice %42 {offsets = [0, 0], sizes = [2, 32], strides = [1, 1]} : vector<2x128xf32> to vector<2x32xf32>
    %45 = vector.extract_strided_slice %42 {offsets = [0, 32], sizes = [2, 32], strides = [1, 1]} : vector<2x128xf32> to vector<2x32xf32>
    %46 = vector.extract_strided_slice %43 {offsets = [0, 64], sizes = [2, 32], strides = [1, 1]} : vector<2x128xf32> to vector<2x32xf32>
    %47 = vector.extract_strided_slice %42 {offsets = [0, 96], sizes = [2, 32], strides = [1, 1]} : vector<2x128xf32> to vector<2x32xf32>
    %48 = arith.mulf %45, %32 : vector<2x32xf32>
    %49 = arith.mulf %44, %46 : vector<2x32xf32>
    %50 = arith.addf %48, %49 : vector<2x32xf32>
    %51 = math.tanh %50 : vector<2x32xf32>
    %52 = arith.mulf %47, %51 : vector<2x32xf32>
    %c0_41 = arith.constant 0 : index
    %c0_42 = arith.constant 0 : index
    %c0_43 = arith.constant 0 : index
    %53 = vector.load %arg24[%c0_41, %c0_42, %c0_43] : memref<2x8x32xf32, #tpu.memory_space<vmem>>, vector<2x1x32xf32>
    %54 = vector.shape_cast %53 : vector<2x1x32xf32> to vector<2x32xf32>
    %55 = vector.shape_cast %52 : vector<2x32xf32> to vector<2x1x32xf32>
    tpu.vector_store %arg24[%c0_41, %c0_42, %c0_43], %55 {strides = array<i32>} : memref<2x8x32xf32, #tpu.memory_space<vmem>>, vector<2x1x32xf32>,
    %c0_44 = arith.constant 0 : index
    %c1 = arith.constant 1 : index
    %c0_45 = arith.constant 0 : index
    %56 = vector.load %arg23[%c0_44, %c1, %c0_45] : memref<2x8x128xf32, #tpu.memory_space<vmem>>, vector<2x1x128xf32>
    %57 = vector.shape_cast %56 : vector<2x1x128xf32> to vector<2x128xf32>
    %cst_46 = arith.constant dense<0.000000e+00> : vector<2x128xf32>
    %58 = tpu.matmul %52, %33, %cst_46 {dimension_numbers = #tpu.dot_dimension_numbers<[1], [0], [0], [1], [0, 0, 1, 1], [], []>} : vector<2x32xf32>, vector<32x128xf32>, vector<2x128xf32> -> vector<2x128xf32>
    %59 = arith.addf %57, %58 : vector<2x128xf32>
    %60 = arith.negf %59 : vector<2x128xf32>
    %61 = math.exp %60 : vector<2x128xf32>
    %cst_47 = arith.constant 1.000000e+00 : f32
    %62 = vector.broadcast %cst_47 : f32 to vector<2x128xf32>
    %63 = arith.addf %62, %61 : vector<2x128xf32>
    %64 = arith.divf %62, %63 : vector<2x128xf32>
    %65 = math.tanh %59 : vector<2x128xf32>
    %66 = vector.extract_strided_slice %64 {offsets = [0, 0], sizes = [2, 32], strides = [1, 1]} : vector<2x128xf32> to vector<2x32xf32>
    %67 = vector.extract_strided_slice %64 {offsets = [0, 32], sizes = [2, 32], strides = [1, 1]} : vector<2x128xf32> to vector<2x32xf32>
    %68 = vector.extract_strided_slice %65 {offsets = [0, 64], sizes = [2, 32], strides = [1, 1]} : vector<2x128xf32> to vector<2x32xf32>
    %69 = vector.extract_strided_slice %64 {offsets = [0, 96], sizes = [2, 32], strides = [1, 1]} : vector<2x128xf32> to vector<2x32xf32>
    %70 = arith.mulf %67, %50 : vector<2x32xf32>
    %71 = arith.mulf %66, %68 : vector<2x32xf32>
    %72 = arith.addf %70, %71 : vector<2x32xf32>
    %73 = math.tanh %72 : vector<2x32xf32>
    %74 = arith.mulf %69, %73 : vector<2x32xf32>
    %c0_48 = arith.constant 0 : index
    %c1_49 = arith.constant 1 : index
    %c0_50 = arith.constant 0 : index
    %75 = vector.load %arg24[%c0_48, %c1_49, %c0_50] : memref<2x8x32xf32, #tpu.memory_space<vmem>>, vector<2x1x32xf32>
    %76 = vector.shape_cast %75 : vector<2x1x32xf32> to vector<2x32xf32>
    %77 = vector.shape_cast %74 : vector<2x32xf32> to vector<2x1x32xf32>
    tpu.vector_store %arg24[%c0_48, %c1_49, %c0_50], %77 {strides = array<i32>} : memref<2x8x32xf32, #tpu.memory_space<vmem>>, vector<2x1x32xf32>,
    %c0_51 = arith.constant 0 : index
    %c2 = arith.constant 2 : index
    %c0_52 = arith.constant 0 : index
    %78 = vector.load %arg23[%c0_51, %c2, %c0_52] : memref<2x8x128xf32, #tpu.memory_space<vmem>>, vector<2x1x128xf32>
    %79 = vector.shape_cast %78 : vector<2x1x128xf32> to vector<2x128xf32>
    %cst_53 = arith.constant dense<0.000000e+00> : vector<2x128xf32>
    %80 = tpu.matmul %74, %33, %cst_53 {dimension_numbers = #tpu.dot_dimension_numbers<[1], [0], [0], [1], [0, 0, 1, 1], [], []>} : vector<2x32xf32>, vector<32x128xf32>, vector<2x128xf32> -> vector<2x128xf32>
    %81 = arith.addf %79, %80 : vector<2x128xf32>
    %82 = arith.negf %81 : vector<2x128xf32>
    %83 = math.exp %82 : vector<2x128xf32>
    %cst_54 = arith.constant 1.000000e+00 : f32
    %84 = vector.broadcast %cst_54 : f32 to vector<2x128xf32>
    %85 = arith.addf %84, %83 : vector<2x128xf32>
    %86 = arith.divf %84, %85 : vector<2x128xf32>
    %87 = math.tanh %81 : vector<2x128xf32>
    %88 = vector.extract_strided_slice %86 {offsets = [0, 0], sizes = [2, 32], strides = [1, 1]} : vector<2x128xf32> to vector<2x32xf32>
    %89 = vector.extract_strided_slice %86 {offsets = [0, 32], sizes = [2, 32], strides = [1, 1]} : vector<2x128xf32> to vector<2x32xf32>
    %90 = vector.extract_strided_slice %87 {offsets = [0, 64], sizes = [2, 32], strides = [1, 1]} : vector<2x128xf32> to vector<2x32xf32>
    %91 = vector.extract_strided_slice %86 {offsets = [0, 96], sizes = [2, 32], strides = [1, 1]} : vector<2x128xf32> to vector<2x32xf32>
    %92 = arith.mulf %89, %72 : vector<2x32xf32>
    %93 = arith.mulf %88, %90 : vector<2x32xf32>
    %94 = arith.addf %92, %93 : vector<2x32xf32>
    %95 = math.tanh %94 : vector<2x32xf32>
    %96 = arith.mulf %91, %95 : vector<2x32xf32>
    %c0_55 = arith.constant 0 : index
    %c2_56 = arith.constant 2 : index
    %c0_57 = arith.constant 0 : index
    %97 = vector.load %arg24[%c0_55, %c2_56, %c0_57] : memref<2x8x32xf32, #tpu.memory_space<vmem>>, vector<2x1x32xf32>
    %98 = vector.shape_cast %97 : vector<2x1x32xf32> to vector<2x32xf32>
    %99 = vector.shape_cast %96 : vector<2x32xf32> to vector<2x1x32xf32>
    tpu.vector_store %arg24[%c0_55, %c2_56, %c0_57], %99 {strides = array<i32>} : memref<2x8x32xf32, #tpu.memory_space<vmem>>, vector<2x1x32xf32>,
    %c0_58 = arith.constant 0 : index
    %c3 = arith.constant 3 : index
    %c0_59 = arith.constant 0 : index
    %100 = vector.load %arg23[%c0_58, %c3, %c0_59] : memref<2x8x128xf32, #tpu.memory_space<vmem>>, vector<2x1x128xf32>
    %101 = vector.shape_cast %100 : vector<2x1x128xf32> to vector<2x128xf32>
    %cst_60 = arith.constant dense<0.000000e+00> : vector<2x128xf32>
    %102 = tpu.matmul %96, %33, %cst_60 {dimension_numbers = #tpu.dot_dimension_numbers<[1], [0], [0], [1], [0, 0, 1, 1], [], []>} : vector<2x32xf32>, vector<32x128xf32>, vector<2x128xf32> -> vector<2x128xf32>
    %103 = arith.addf %101, %102 : vector<2x128xf32>
    %104 = arith.negf %103 : vector<2x128xf32>
    %105 = math.exp %104 : vector<2x128xf32>
    %cst_61 = arith.constant 1.000000e+00 : f32
    %106 = vector.broadcast %cst_61 : f32 to vector<2x128xf32>
    %107 = arith.addf %106, %105 : vector<2x128xf32>
    %108 = arith.divf %106, %107 : vector<2x128xf32>
    %109 = math.tanh %103 : vector<2x128xf32>
    %110 = vector.extract_strided_slice %108 {offsets = [0, 0], sizes = [2, 32], strides = [1, 1]} : vector<2x128xf32> to vector<2x32xf32>
    %111 = vector.extract_strided_slice %108 {offsets = [0, 32], sizes = [2, 32], strides = [1, 1]} : vector<2x128xf32> to vector<2x32xf32>
    %112 = vector.extract_strided_slice %109 {offsets = [0, 64], sizes = [2, 32], strides = [1, 1]} : vector<2x128xf32> to vector<2x32xf32>
    %113 = vector.extract_strided_slice %108 {offsets = [0, 96], sizes = [2, 32], strides = [1, 1]} : vector<2x128xf32> to vector<2x32xf32>
    %114 = arith.mulf %111, %94 : vector<2x32xf32>
    %115 = arith.mulf %110, %112 : vector<2x32xf32>
    %116 = arith.addf %114, %115 : vector<2x32xf32>
    %117 = math.tanh %116 : vector<2x32xf32>
    %118 = arith.mulf %113, %117 : vector<2x32xf32>
    %c0_62 = arith.constant 0 : index
    %c3_63 = arith.constant 3 : index
    %c0_64 = arith.constant 0 : index
    %119 = vector.load %arg24[%c0_62, %c3_63, %c0_64] : memref<2x8x32xf32, #tpu.memory_space<vmem>>, vector<2x1x32xf32>
    %120 = vector.shape_cast %119 : vector<2x1x32xf32> to vector<2x32xf32>
    %121 = vector.shape_cast %118 : vector<2x32xf32> to vector<2x1x32xf32>
    tpu.vector_store %arg24[%c0_62, %c3_63, %c0_64], %121 {strides = array<i32>} : memref<2x8x32xf32, #tpu.memory_space<vmem>>, vector<2x1x32xf32>,
    %c0_65 = arith.constant 0 : index
    %c4 = arith.constant 4 : index
    %c0_66 = arith.constant 0 : index
    %122 = vector.load %arg23[%c0_65, %c4, %c0_66] : memref<2x8x128xf32, #tpu.memory_space<vmem>>, vector<2x1x128xf32>
    %123 = vector.shape_cast %122 : vector<2x1x128xf32> to vector<2x128xf32>
    %cst_67 = arith.constant dense<0.000000e+00> : vector<2x128xf32>
    %124 = tpu.matmul %118, %33, %cst_67 {dimension_numbers = #tpu.dot_dimension_numbers<[1], [0], [0], [1], [0, 0, 1, 1], [], []>} : vector<2x32xf32>, vector<32x128xf32>, vector<2x128xf32> -> vector<2x128xf32>
    %125 = arith.addf %123, %124 : vector<2x128xf32>
    %126 = arith.negf %125 : vector<2x128xf32>
    %127 = math.exp %126 : vector<2x128xf32>
    %cst_68 = arith.constant 1.000000e+00 : f32
    %128 = vector.broadcast %cst_68 : f32 to vector<2x128xf32>
    %129 = arith.addf %128, %127 : vector<2x128xf32>
    %130 = arith.divf %128, %129 : vector<2x128xf32>
    %131 = math.tanh %125 : vector<2x128xf32>
    %132 = vector.extract_strided_slice %130 {offsets = [0, 0], sizes = [2, 32], strides = [1, 1]} : vector<2x128xf32> to vector<2x32xf32>
    %133 = vector.extract_strided_slice %130 {offsets = [0, 32], sizes = [2, 32], strides = [1, 1]} : vector<2x128xf32> to vector<2x32xf32>
    %134 = vector.extract_strided_slice %131 {offsets = [0, 64], sizes = [2, 32], strides = [1, 1]} : vector<2x128xf32> to vector<2x32xf32>
    %135 = vector.extract_strided_slice %130 {offsets = [0, 96], sizes = [2, 32], strides = [1, 1]} : vector<2x128xf32> to vector<2x32xf32>
    %136 = arith.mulf %133, %116 : vector<2x32xf32>
    %137 = arith.mulf %132, %134 : vector<2x32xf32>
    %138 = arith.addf %136, %137 : vector<2x32xf32>
    %139 = math.tanh %138 : vector<2x32xf32>
    %140 = arith.mulf %135, %139 : vector<2x32xf32>
    %c0_69 = arith.constant 0 : index
    %c4_70 = arith.constant 4 : index
    %c0_71 = arith.constant 0 : index
    %141 = vector.load %arg24[%c0_69, %c4_70, %c0_71] : memref<2x8x32xf32, #tpu.memory_space<vmem>>, vector<2x1x32xf32>
    %142 = vector.shape_cast %141 : vector<2x1x32xf32> to vector<2x32xf32>
    %143 = vector.shape_cast %140 : vector<2x32xf32> to vector<2x1x32xf32>
    tpu.vector_store %arg24[%c0_69, %c4_70, %c0_71], %143 {strides = array<i32>} : memref<2x8x32xf32, #tpu.memory_space<vmem>>, vector<2x1x32xf32>,
    %c0_72 = arith.constant 0 : index
    %c5 = arith.constant 5 : index
    %c0_73 = arith.constant 0 : index
    %144 = vector.load %arg23[%c0_72, %c5, %c0_73] : memref<2x8x128xf32, #tpu.memory_space<vmem>>, vector<2x1x128xf32>
    %145 = vector.shape_cast %144 : vector<2x1x128xf32> to vector<2x128xf32>
    %cst_74 = arith.constant dense<0.000000e+00> : vector<2x128xf32>
    %146 = tpu.matmul %140, %33, %cst_74 {dimension_numbers = #tpu.dot_dimension_numbers<[1], [0], [0], [1], [0, 0, 1, 1], [], []>} : vector<2x32xf32>, vector<32x128xf32>, vector<2x128xf32> -> vector<2x128xf32>
    %147 = arith.addf %145, %146 : vector<2x128xf32>
    %148 = arith.negf %147 : vector<2x128xf32>
    %149 = math.exp %148 : vector<2x128xf32>
    %cst_75 = arith.constant 1.000000e+00 : f32
    %150 = vector.broadcast %cst_75 : f32 to vector<2x128xf32>
    %151 = arith.addf %150, %149 : vector<2x128xf32>
    %152 = arith.divf %150, %151 : vector<2x128xf32>
    %153 = math.tanh %147 : vector<2x128xf32>
    %154 = vector.extract_strided_slice %152 {offsets = [0, 0], sizes = [2, 32], strides = [1, 1]} : vector<2x128xf32> to vector<2x32xf32>
    %155 = vector.extract_strided_slice %152 {offsets = [0, 32], sizes = [2, 32], strides = [1, 1]} : vector<2x128xf32> to vector<2x32xf32>
    %156 = vector.extract_strided_slice %153 {offsets = [0, 64], sizes = [2, 32], strides = [1, 1]} : vector<2x128xf32> to vector<2x32xf32>
    %157 = vector.extract_strided_slice %152 {offsets = [0, 96], sizes = [2, 32], strides = [1, 1]} : vector<2x128xf32> to vector<2x32xf32>
    %158 = arith.mulf %155, %138 : vector<2x32xf32>
    %159 = arith.mulf %154, %156 : vector<2x32xf32>
    %160 = arith.addf %158, %159 : vector<2x32xf32>
    %161 = math.tanh %160 : vector<2x32xf32>
    %162 = arith.mulf %157, %161 : vector<2x32xf32>
    %c0_76 = arith.constant 0 : index
    %c5_77 = arith.constant 5 : index
    %c0_78 = arith.constant 0 : index
    %163 = vector.load %arg24[%c0_76, %c5_77, %c0_78] : memref<2x8x32xf32, #tpu.memory_space<vmem>>, vector<2x1x32xf32>
    %164 = vector.shape_cast %163 : vector<2x1x32xf32> to vector<2x32xf32>
    %165 = vector.shape_cast %162 : vector<2x32xf32> to vector<2x1x32xf32>
    tpu.vector_store %arg24[%c0_76, %c5_77, %c0_78], %165 {strides = array<i32>} : memref<2x8x32xf32, #tpu.memory_space<vmem>>, vector<2x1x32xf32>,
    %c0_79 = arith.constant 0 : index
    %c6 = arith.constant 6 : index
    %c0_80 = arith.constant 0 : index
    %166 = vector.load %arg23[%c0_79, %c6, %c0_80] : memref<2x8x128xf32, #tpu.memory_space<vmem>>, vector<2x1x128xf32>
    %167 = vector.shape_cast %166 : vector<2x1x128xf32> to vector<2x128xf32>
    %cst_81 = arith.constant dense<0.000000e+00> : vector<2x128xf32>
    %168 = tpu.matmul %162, %33, %cst_81 {dimension_numbers = #tpu.dot_dimension_numbers<[1], [0], [0], [1], [0, 0, 1, 1], [], []>} : vector<2x32xf32>, vector<32x128xf32>, vector<2x128xf32> -> vector<2x128xf32>
    %169 = arith.addf %167, %168 : vector<2x128xf32>
    %170 = arith.negf %169 : vector<2x128xf32>
    %171 = math.exp %170 : vector<2x128xf32>
    %cst_82 = arith.constant 1.000000e+00 : f32
    %172 = vector.broadcast %cst_82 : f32 to vector<2x128xf32>
    %173 = arith.addf %172, %171 : vector<2x128xf32>
    %174 = arith.divf %172, %173 : vector<2x128xf32>
    %175 = math.tanh %169 : vector<2x128xf32>
    %176 = vector.extract_strided_slice %174 {offsets = [0, 0], sizes = [2, 32], strides = [1, 1]} : vector<2x128xf32> to vector<2x32xf32>
    %177 = vector.extract_strided_slice %174 {offsets = [0, 32], sizes = [2, 32], strides = [1, 1]} : vector<2x128xf32> to vector<2x32xf32>
    %178 = vector.extract_strided_slice %175 {offsets = [0, 64], sizes = [2, 32], strides = [1, 1]} : vector<2x128xf32> to vector<2x32xf32>
    %179 = vector.extract_strided_slice %174 {offsets = [0, 96], sizes = [2, 32], strides = [1, 1]} : vector<2x128xf32> to vector<2x32xf32>
    %180 = arith.mulf %177, %160 : vector<2x32xf32>
    %181 = arith.mulf %176, %178 : vector<2x32xf32>
    %182 = arith.addf %180, %181 : vector<2x32xf32>
    %183 = math.tanh %182 : vector<2x32xf32>
    %184 = arith.mulf %179, %183 : vector<2x32xf32>
    %c0_83 = arith.constant 0 : index
    %c6_84 = arith.constant 6 : index
    %c0_85 = arith.constant 0 : index
    %185 = vector.load %arg24[%c0_83, %c6_84, %c0_85] : memref<2x8x32xf32, #tpu.memory_space<vmem>>, vector<2x1x32xf32>
    %186 = vector.shape_cast %185 : vector<2x1x32xf32> to vector<2x32xf32>
    %187 = vector.shape_cast %184 : vector<2x32xf32> to vector<2x1x32xf32>
    tpu.vector_store %arg24[%c0_83, %c6_84, %c0_85], %187 {strides = array<i32>} : memref<2x8x32xf32, #tpu.memory_space<vmem>>, vector<2x1x32xf32>,
    %c0_86 = arith.constant 0 : index
    %c7 = arith.constant 7 : index
    %c0_87 = arith.constant 0 : index
    %188 = vector.load %arg23[%c0_86, %c7, %c0_87] : memref<2x8x128xf32, #tpu.memory_space<vmem>>, vector<2x1x128xf32>
    %189 = vector.shape_cast %188 : vector<2x1x128xf32> to vector<2x128xf32>
    %cst_88 = arith.constant dense<0.000000e+00> : vector<2x128xf32>
    %190 = tpu.matmul %184, %33, %cst_88 {dimension_numbers = #tpu.dot_dimension_numbers<[1], [0], [0], [1], [0, 0, 1, 1], [], []>} : vector<2x32xf32>, vector<32x128xf32>, vector<2x128xf32> -> vector<2x128xf32>
    %191 = arith.addf %189, %190 : vector<2x128xf32>
    %192 = arith.negf %191 : vector<2x128xf32>
    %193 = math.exp %192 : vector<2x128xf32>
    %cst_89 = arith.constant 1.000000e+00 : f32
    %194 = vector.broadcast %cst_89 : f32 to vector<2x128xf32>
    %195 = arith.addf %194, %193 : vector<2x128xf32>
    %196 = arith.divf %194, %195 : vector<2x128xf32>
    %197 = math.tanh %191 : vector<2x128xf32>
    %198 = vector.extract_strided_slice %196 {offsets = [0, 0], sizes = [2, 32], strides = [1, 1]} : vector<2x128xf32> to vector<2x32xf32>
    %199 = vector.extract_strided_slice %196 {offsets = [0, 32], sizes = [2, 32], strides = [1, 1]} : vector<2x128xf32> to vector<2x32xf32>
    %200 = vector.extract_strided_slice %197 {offsets = [0, 64], sizes = [2, 32], strides = [1, 1]} : vector<2x128xf32> to vector<2x32xf32>
    %201 = vector.extract_strided_slice %196 {offsets = [0, 96], sizes = [2, 32], strides = [1, 1]} : vector<2x128xf32> to vector<2x32xf32>
    %202 = arith.mulf %199, %182 : vector<2x32xf32>
    %203 = arith.mulf %198, %200 : vector<2x32xf32>
    %204 = arith.addf %202, %203 : vector<2x32xf32>
    %205 = math.tanh %204 : vector<2x32xf32>
    %206 = arith.mulf %201, %205 : vector<2x32xf32>
    %c0_90 = arith.constant 0 : index
    %c7_91 = arith.constant 7 : index
    %c0_92 = arith.constant 0 : index
    %207 = vector.load %arg24[%c0_90, %c7_91, %c0_92] : memref<2x8x32xf32, #tpu.memory_space<vmem>>, vector<2x1x32xf32>
    %208 = vector.shape_cast %207 : vector<2x1x32xf32> to vector<2x32xf32>
    %209 = vector.shape_cast %206 : vector<2x32xf32> to vector<2x1x32xf32>
    tpu.vector_store %arg24[%c0_90, %c7_91, %c0_92], %209 {strides = array<i32>} : memref<2x8x32xf32, #tpu.memory_space<vmem>>, vector<2x1x32xf32>,
    %c0_93 = arith.constant 0 : index
    %c0_94 = arith.constant 0 : index
    %210 = vector.load %arg21[%c0_93, %c0_94] : memref<2x32xf32, #tpu.memory_space<vmem>>, vector<2x32xf32>
    tpu.vector_store %arg21[%c0_93, %c0_94], %206 {strides = array<i32>} : memref<2x32xf32, #tpu.memory_space<vmem>>, vector<2x32xf32>,
    %c0_95 = arith.constant 0 : index
    %c0_96 = arith.constant 0 : index
    %211 = vector.load %arg22[%c0_95, %c0_96] : memref<2x32xf32, #tpu.memory_space<vmem>>, vector<2x32xf32>
    tpu.vector_store %arg22[%c0_95, %c0_96], %204 {strides = array<i32>} : memref<2x32xf32, #tpu.memory_space<vmem>>, vector<2x32xf32>,
    %c0_97 = arith.constant 0 : index
    %c0_98 = arith.constant 0 : index
    %c0_99 = arith.constant 0 : index
    %212 = vector.load %arg24[%c0_97, %c0_98, %c0_99] : memref<2x8x32xf32, #tpu.memory_space<vmem>>, vector<2x8x32xf32>
    %213 = vector.shape_cast %212 : vector<2x8x32xf32> to vector<16x32xf32>
    %c0_100 = arith.constant 0 : index
    %c0_101 = arith.constant 0 : index
    %214 = vector.load %arg14[%c0_100, %c0_101] : memref<32x32xf32, #tpu.memory_space<vmem>>, vector<32x32xf32>
    %cst_102 = arith.constant dense<0.000000e+00> : vector<16x32xf32>
    %215 = tpu.matmul %213, %214, %cst_102 {dimension_numbers = #tpu.dot_dimension_numbers<[1], [0], [0], [1], [0, 0, 1, 1], [], []>} : vector<16x32xf32>, vector<32x32xf32>, vector<16x32xf32> -> vector<16x32xf32>
    %c0_103 = arith.constant 0 : index
    %c0_104 = arith.constant 0 : index
    %216 = vector.load %arg15[%c0_103, %c0_104] : memref<1x32xf32, #tpu.memory_space<vmem>>, vector<1x32xf32>
    %217 = vector.broadcast %216 : vector<1x32xf32> to vector<16x32xf32>
    %218 = arith.addf %215, %217 : vector<16x32xf32>
    %cst_105 = arith.constant 0.000000e+00 : f32
    %219 = vector.broadcast %cst_105 : f32 to vector<16x32xf32>
    %220 = arith.maximumf %218, %219 : vector<16x32xf32>
    %c0_106 = arith.constant 0 : index
    %c0_107 = arith.constant 0 : index
    %221 = vector.load %arg16[%c0_106, %c0_107] : memref<32x2xf32, #tpu.memory_space<vmem>>, vector<32x2xf32>
    %cst_108 = arith.constant dense<0.000000e+00> : vector<16x2xf32>
    %222 = tpu.matmul %220, %221, %cst_108 {dimension_numbers = #tpu.dot_dimension_numbers<[1], [0], [0], [1], [0, 0, 1, 1], [], []>} : vector<16x32xf32>, vector<32x2xf32>, vector<16x2xf32> -> vector<16x2xf32>
    %c0_109 = arith.constant 0 : index
    %c0_110 = arith.constant 0 : index
    %223 = vector.load %arg17[%c0_109, %c0_110] : memref<1x2xf32, #tpu.memory_space<vmem>>, vector<1x2xf32>
    %224 = vector.broadcast %223 : vector<1x2xf32> to vector<16x2xf32>
    %225 = arith.addf %222, %224 : vector<16x2xf32>
    %226 = math.tanh %225 : vector<16x2xf32>
    %c0_111 = arith.constant 0 : index
    %c0_112 = arith.constant 0 : index
    %227 = vector.load %arg18[%c0_111, %c0_112] : memref<1x2xf32, #tpu.memory_space<vmem>>, vector<1x2xf32>
    %228 = vector.broadcast %227 : vector<1x2xf32> to vector<16x2xf32>
    %229 = arith.mulf %226, %228 : vector<16x2xf32>
    %c0_113 = arith.constant 0 : index
    %c0_114 = arith.constant 0 : index
    %230 = vector.load %arg19[%c0_113, %c0_114] : memref<1x2xf32, #tpu.memory_space<vmem>>, vector<1x2xf32>
    %231 = vector.broadcast %230 : vector<1x2xf32> to vector<16x2xf32>
    %232 = arith.addf %229, %231 : vector<16x2xf32>
    %c0_115 = arith.constant 0 : index
    %c0_116 = arith.constant 0 : index
    %233 = vector.load %arg20[%c0_115, %c0_116] : memref<16x2xf32, #tpu.memory_space<vmem>>, vector<16x2xf32>
    tpu.vector_store %arg20[%c0_115, %c0_116], %232 {strides = array<i32>} : memref<16x2xf32, #tpu.memory_space<vmem>>, vector<16x2xf32>,
    return
  }
}

</mosaic_0001>

<bundles_post_ra>
// kernel: actor_forward.1
= control target key start
LH: loop header
LB: loop body
LE: loop exit
PB: predicated region body
PF: predicated region fallthrough
CT: control target
= control target key end

     0   :  { %s3421_s0 = inlined_call_operand.hbm [shape: f32[16,32], index: 0, kind: input, shape index: {}]   ;;  %s3422_s1 = inlined_call_operand.vmem [shape: f32[16,4], index: 1, kind: input, shape index: {}]   ;;  %s3423_s2 = inlined_call_operand.hbm [shape: f32[2,32], index: 2, kind: input, shape index: {}]   ;;  %s3424_s3 = inlined_call_operand.vmem [shape: f32[2,32], index: 3, kind: input, shape index: {}]   ;;  %s3425_s4 = inlined_call_operand.vmem [shape: f32[32,32], index: 4, kind: input, shape index: {}]   ;;  %s3426_s5 = inlined_call_operand.hbm [shape: f32[1,32], index: 5, kind: input, shape index: {}]   ;;  %s3427_s6 = inlined_call_operand.vmem [shape: f32[32,32], index: 6, kind: input, shape index: {}]   ;;  %s3428_s7 = inlined_call_operand.hbm [shape: f32[1,32], index: 7, kind: input, shape index: {}]   ;;  %s3429_s8 = inlined_call_operand.vmem [shape: f32[32,16], index: 8, kind: input, shape index: {}]   ;;  %s3430_s9 = inlined_call_operand.hbm [shape: f32[1,16], index: 9, kind: input, shape index: {}]   ;;  %s3431_s10 = inlined_call_operand.vmem [shape: f32[16,128], index: 10, kind: input, shape index: {}]   ;;  %s3432_s11 = inlined_call_operand.vmem [shape: f32[4,128], index: 11, kind: input, shape index: {}]   ;;  %s3433_s12 = inlined_call_operand.vmem [shape: f32[32,128], index: 12, kind: input, shape index: {}]   ;;  %s3434_s13 = inlined_call_operand.hbm [shape: f32[1,128], index: 13, kind: input, shape index: {}]   ;;  %s3435_s14 = inlined_call_operand.vmem [shape: f32[32,32], index: 14, kind: input, shape index: {}]   ;;  %s3436_s15 = inlined_call_operand.hbm [shape: f32[1,32], index: 15, kind: input, shape index: {}]   ;;  %s3437_s16 = inlined_call_operand.vmem [shape: f32[32,2], index: 16, kind: input, shape index: {}]   ;;  %s3438_s17 = inlined_call_operand.hbm [shape: f32[1,2], index: 17, kind: input, shape index: {}]   ;;  %s3439_s18 = inlined_call_operand.vmem [shape: f32[1,2], index: 18, kind: input, shape index: {}]   ;;  %s3440_s19 = inlined_call_operand.hbm [shape: f32[1,2], index: 19, kind: input, shape index: {}]   ;;  %s3441_s20 = inlined_call_operand.vmem [shape: f32[16,2], index: 20, kind: output, shape index: {0}]   ;;  %s3442_s21 = inlined_call_operand.hbm [shape: f32[2,32], index: 21, kind: output, shape index: {1}]   ;;  %s3443_s22 = inlined_call_operand.hbm [shape: f32[2,32], index: 22, kind: output, shape index: {2}]  }
   0x1   :  { %3450 = sst [smem:[#allocation29_spill]] %s3421_s0 }
   0x2   :  { %3451 = sst [smem:[#allocation30_spill]] %s3422_s1 }
   0x3   :  { %3452 = sst [smem:[#allocation31_spill]] %s3423_s2 }
   0x4   :  { %3453 = sst [smem:[#allocation32_spill]] %s3424_s3 }
   0x5   :  { %3454 = sst [smem:[#allocation33_spill]] %s3425_s4 }
   0x6   :  { %3455 = sst [smem:[#allocation34_spill]] %s3426_s5 }
   0x7   :  { %3456 = sst [smem:[#allocation35_spill]] %s3427_s6 }
   0x8   :  { %28 = vsyncpa [#allocation5], 0 }
   0x9   :  { %29 = vsyncpa [#allocation8], 0 }
   0xa   :  { %30 = vsyncpa [#allocation11], 0 }
   0xb   :  { %31 = vsyncpa [#allocation14], 0 }
   0xc   :  { %32 = vsyncpa [#allocation17], 0 }
   0xd   :  { %33 = vsyncpa [#allocation6], 0 }
   0xe   :  { %34 = vsyncpa [#allocation21], 0  ;;  %s2835_s3 = smov [#allocation7]   ;;  %s2836_s29 = smov [#allocation10]  }
   0xf   :  { %s55_s28 = sshll.u32 %s2835_s3, 4  ;;  %s81_s30 = sshll.u32 %s2836_s29, 4  ;;  %s56_s28 = int_to_ptr.vmem [resolvable:$true] %s55_s28  ;;  %s82_s30 = int_to_ptr.vmem [resolvable:$true] %s81_s30 }
  0x10   :  { %s3457_s23 = sld [smem:[#allocation31_spill]] }
  0x16   :  { %s2579_s1 = scalar_lea.hbm %s3457_s23, 32 }
  0x17   :  { %p2580_p0 = scmp.ne.s32.totalorder %s3457_s23, %s2579_s1  ;;  %p2583_p1 = scmp.lt.u32.totalorder %s2579_s1, %s3457_s23 }
  0x19   :  { %p2585_p2 = pnand %p2583_p1, %p2580_p0 }
  0x1b   :  { %2588 = shalt.err (!%p2585_p2)
}
  0x1c   :  { %s2589_s26 = scalar_lea.vmem %s56_s28, 32  ;;  %p2594_p4 = scmp.lt.s32.totalorder %s56_s28, %s56_s28 }
  0x1d   :  { %p2590_p3 = scmp.ne.s32.totalorder %s56_s28, %s2589_s26  ;;  %p2595_p5 = scmp.lt.s32.totalorder %s2589_s26, %s2589_s26 }
  0x1f   :  { %p2596_p6 = por %p2595_p5, %p2594_p4 }
  0x21   :  { %p2597_p7 = pnand %p2596_p6, %p2590_p3 }
  0x23   :  { %2600 = shalt.err (!%p2597_p7)
}
  0x24   :  { %58 = dma.hbm_to_vmem [thread:$0]  %s3457_s23, 32, %s56_s28, [#allocation8]  }
  0x25   :  { %s2601_s4 = scalar_lea.hbm %s3428_s7, 16 }
  0x26   :  { %p2602_p8 = scmp.ne.s32.totalorder %s3428_s7, %s2601_s4  ;;  %p2605_p9 = scmp.lt.u32.totalorder %s2601_s4, %s3428_s7 }
  0x28   :  { %p2607_p10 = pnand %p2605_p9, %p2602_p8 }
  0x2a   :  { %2610 = shalt.err (!%p2607_p10)
}
  0x2b   :  { %s2611_s6 = scalar_lea.vmem %s82_s30, 16  ;;  %s2615_s25 = scalar_lea.vmem %s82_s30, 32 }
  0x2c   :  { %p2612_p11 = scmp.ne.s32.totalorder %s82_s30, %s2611_s6  ;;  %p2616_p12 = scmp.lt.s32.totalorder %s82_s30, %s82_s30 }
  0x2d   :  { %p2617_p13 = scmp.lt.s32.totalorder %s2615_s25, %s2611_s6 }
  0x2f   :  { %p2618_p0 = por %p2617_p13, %p2616_p12 }
  0x31   :  { %p2619_p1 = pnand %p2618_p0, %p2612_p11 }
  0x33   :  { %2622 = shalt.err (!%p2619_p1)
}
  0x34   :  { %84 = dma.hbm_to_vmem [thread:$0]  %s3428_s7, 16, %s82_s30, [#allocation11]  }
  0x35   :  { %s2837_s26 = smov [#allocation13]   ;;  %s2838_s27 = smov [#allocation16]  }
  0x36   :  { %s109_s2 = sshll.u32 %s2837_s26, 4  ;;  %s133_s3 = sshll.u32 %s2838_s27, 4  ;;  %s110_s2 = int_to_ptr.vmem [resolvable:$true] %s109_s2  ;;  %s134_s3 = int_to_ptr.vmem [resolvable:$true] %s133_s3 }
  0x37   :  { %s2623_s0 = scalar_lea.hbm %s3434_s13, 16 }
  0x38   :  { %p2624_p2 = scmp.ne.s32.totalorder %s3434_s13, %s2623_s0  ;;  %p2627_p3 = scmp.lt.u32.totalorder %s2623_s0, %s3434_s13 }
  0x3a   :  { %p2629_p4 = pnand %p2627_p3, %p2624_p2 }
  0x3c   :  { %2632 = shalt.err (!%p2629_p4)
}
  0x3d   :  { %s2633_s7 = scalar_lea.vmem %s110_s2, 16  ;;  %s2637_s30 = scalar_lea.vmem %s110_s2, 32 }
  0x3e   :  { %p2634_p5 = scmp.ne.s32.totalorder %s110_s2, %s2633_s7  ;;  %p2638_p6 = scmp.lt.s32.totalorder %s110_s2, %s110_s2 }
  0x3f   :  { %p2639_p7 = scmp.lt.s32.totalorder %s2637_s30, %s2633_s7 }
  0x41   :  { %p2640_p8 = por %p2639_p7, %p2638_p6 }
  0x43   :  { %p2641_p9 = pnand %p2640_p8, %p2634_p5 }
  0x45   :  { %2644 = shalt.err (!%p2641_p9)
}
  0x46   :  { %112 = dma.hbm_to_vmem [thread:$0]  %s3434_s13, 16, %s110_s2, [#allocation14]  }
  0x47   :  { %s2645_s27 = scalar_lea.hbm %s3438_s17, 16 }
  0x48   :  { %p2646_p10 = scmp.ne.s32.totalorder %s3438_s17, %s2645_s27  ;;  %p2649_p11 = scmp.lt.u32.totalorder %s2645_s27, %s3438_s17 }
  0x4a   :  { %p2651_p12 = pnand %p2649_p11, %p2646_p10 }
  0x4c   :  { %2654 = shalt.err (!%p2651_p12)
}
  0x4d   :  { %s2655_s1 = scalar_lea.vmem %s134_s3, 16  ;;  %s2659_s24 = scalar_lea.vmem %s134_s3, 32 }
  0x4e   :  { %p2656_p13 = scmp.ne.s32.totalorder %s134_s3, %s2655_s1  ;;  %p2660_p0 = scmp.lt.s32.totalorder %s134_s3, %s134_s3 }
  0x4f   :  { %p2661_p1 = scmp.lt.s32.totalorder %s2659_s24, %s2655_s1 }
  0x51   :  { %p2662_p2 = por %p2661_p1, %p2660_p0 }
  0x53   :  { %p2663_p3 = pnand %p2662_p2, %p2656_p13 }
  0x55   :  { %2666 = shalt.err (!%p2663_p3)
}
  0x56   :  { %136 = dma.hbm_to_vmem [thread:$0]  %s3438_s17, 16, %s134_s3, [#allocation17]  }
  0x57   :  { %s2839_s6 = smov [#allocation4]   ;;  %s3458_s28 = sld [smem:[#allocation29_spill]] }
  0x58   :  { %s40_s7 = sshll.u32 %s2839_s6, 4  ;;  %s41_s7 = int_to_ptr.vmem [resolvable:$true] %s40_s7 }
  0x5d   :  { %s2667_s23 = scalar_lea.hbm %s3458_s28, 256 }
  0x5e   :  { %p2668_p4 = scmp.ne.s32.totalorder %s3458_s28, %s2667_s23  ;;  %p2671_p5 = scmp.lt.u32.totalorder %s2667_s23, %s3458_s28 }
  0x60   :  { %p2673_p6 = pnand %p2671_p5, %p2668_p4 }
  0x62   :  { %2676 = shalt.err (!%p2673_p6)
}
  0x63   :  { %s2677_s0 = scalar_lea.vmem %s41_s7, 256  ;;  %p2682_p8 = scmp.lt.s32.totalorder %s41_s7, %s41_s7 }
  0x64   :  { %p2678_p7 = scmp.ne.s32.totalorder %s41_s7, %s2677_s0  ;;  %p2683_p9 = scmp.lt.s32.totalorder %s2677_s0, %s2677_s0 }
  0x66   :  { %p2684_p10 = por %p2683_p9, %p2682_p8 }
  0x68   :  { %p2685_p11 = pnand %p2684_p10, %p2678_p7 }
  0x6a   :  { %2688 = shalt.err (!%p2685_p11)
}
  0x6b   :  { %s2840_s17 = smov 128   ;;  %s2841_s3 = smov 8  }
  0x6c   :  { %46 = dma.hbm_to_vmem [thread:$0]  %s3458_s28, 256, %s41_s7, [#allocation5], %s2840_s17, %s2840_s17, %s2841_s3  }
  0x6d   :  { %s2842_s24 = smov [#allocation9]   ;;  %s2843_s2 = smov [#allocation12]  }
  0x6e   :  { %s69_s13 = sshll.u32 %s2842_s24, 4  ;;  %s93_s6 = sshll.u32 %s2843_s2, 4  ;;  %s70_s13 = int_to_ptr.vmem [resolvable:$true] %s69_s13  ;;  %s94_s6 = int_to_ptr.vmem [resolvable:$true] %s93_s6 }
  0x6f   :  { %s3459_s23 = sld [smem:[#allocation34_spill]] }
  0x75   :  { %s2689_s26 = scalar_lea.hbm %s3459_s23, 16 }
  0x76   :  { %p2690_p12 = scmp.ne.s32.totalorder %s3459_s23, %s2689_s26  ;;  %p2693_p13 = scmp.lt.u32.totalorder %s2689_s26, %s3459_s23 }
  0x78   :  { %p2695_p0 = pnand %p2693_p13, %p2690_p12 }
  0x7a   :  { %2698 = shalt.err (!%p2695_p0)
}
  0x7b   :  { %s2699_s7 = scalar_lea.vmem %s70_s13, 16  ;;  %s2703_s28 = scalar_lea.vmem %s70_s13, 32 }
  0x7c   :  { %p2700_p1 = scmp.ne.s32.totalorder %s70_s13, %s2699_s7  ;;  %p2704_p2 = scmp.lt.s32.totalorder %s70_s13, %s70_s13 }
  0x7d   :  { %p2705_p3 = scmp.lt.s32.totalorder %s2703_s28, %s2699_s7 }
  0x7f   :  { %p2706_p4 = por %p2705_p3, %p2704_p2 }
  0x81   :  { %p2707_p5 = pnand %p2706_p4, %p2700_p1 }
  0x83   :  { %2710 = shalt.err (!%p2707_p5)
}
  0x84   :  { %72 = dma.hbm_to_vmem [thread:$0]  %s3459_s23, 16, %s70_s13, [#allocation8]  }
  0x85   :  { %s2711_s24 = scalar_lea.hbm %s3430_s9, 16 }
  0x86   :  { %p2712_p6 = scmp.ne.s32.totalorder %s3430_s9, %s2711_s24  ;;  %p2715_p7 = scmp.lt.u32.totalorder %s2711_s24, %s3430_s9 }
  0x88   :  { %p2717_p8 = pnand %p2715_p7, %p2712_p6 }
  0x8a   :  { %2720 = shalt.err (!%p2717_p8)
}
  0x8b   :  { %s2721_s27 = scalar_lea.vmem %s94_s6, 16  ;;  %s2725_s29 = scalar_lea.vmem %s94_s6, 32 }
  0x8c   :  { %p2722_p9 = scmp.ne.s32.totalorder %s94_s6, %s2721_s27  ;;  %p2726_p10 = scmp.lt.s32.totalorder %s94_s6, %s94_s6 }
  0x8d   :  { %p2727_p11 = scmp.lt.s32.totalorder %s2725_s29, %s2721_s27 }
  0x8f   :  { %p2728_p12 = por %p2727_p11, %p2726_p10 }
  0x91   :  { %p2729_p13 = pnand %p2728_p12, %p2722_p9 }
  0x93   :  { %2732 = shalt.err (!%p2729_p13)
}
  0x94   :  { %96 = dma.hbm_to_vmem [thread:$0]  %s3430_s9, 16, %s94_s6, [#allocation11]  }
  0x95   :  { %s2844_s4 = smov [#allocation15]   ;;  %s2845_s7 = smov [#allocation18]  }
  0x96   :  { %s121_s0 = sshll.u32 %s2844_s4, 4  ;;  %s145_s28 = sshll.u32 %s2845_s7, 4  ;;  %s122_s0 = int_to_ptr.vmem [resolvable:$true] %s121_s0  ;;  %s146_s28 = int_to_ptr.vmem [resolvable:$true] %s145_s28 }
  0x97   :  { %s2733_s5 = scalar_lea.hbm %s3436_s15, 16 }
  0x98   :  { %p2734_p0 = scmp.ne.s32.totalorder %s3436_s15, %s2733_s5  ;;  %p2737_p1 = scmp.lt.u32.totalorder %s2733_s5, %s3436_s15 }
  0x9a   :  { %p2739_p2 = pnand %p2737_p1, %p2734_p0 }
  0x9c   :  { %2742 = shalt.err (!%p2739_p2)
}
  0x9d   :  { %s2743_s9 = scalar_lea.vmem %s122_s0, 16  ;;  %s2747_s6 = scalar_lea.vmem %s122_s0, 32 }
  0x9e   :  { %p2744_p3 = scmp.ne.s32.totalorder %s122_s0, %s2743_s9  ;;  %p2748_p4 = scmp.lt.s32.totalorder %s122_s0, %s122_s0 }
  0x9f   :  { %p2749_p5 = scmp.lt.s32.totalorder %s2747_s6, %s2743_s9 }
  0xa1   :  { %p2750_p6 = por %p2749_p5, %p2748_p4 }
  0xa3   :  { %p2751_p7 = pnand %p2750_p6, %p2744_p3 }
  0xa5   :  { %2754 = shalt.err (!%p2751_p7)
}
  0xa6   :  { %124 = dma.hbm_to_vmem [thread:$0]  %s3436_s15, 16, %s122_s0, [#allocation14]  }
  0xa7   :  { %s2755_s13 = scalar_lea.hbm %s3440_s19, 16 }
  0xa8   :  { %p2756_p8 = scmp.ne.s32.totalorder %s3440_s19, %s2755_s13  ;;  %p2759_p9 = scmp.lt.u32.totalorder %s2755_s13, %s3440_s19 }
  0xaa   :  { %p2761_p10 = pnand %p2759_p9, %p2756_p8 }
  0xac   :  { %2764 = shalt.err (!%p2761_p10)
}
  0xad   :  { %s2765_s3 = scalar_lea.vmem %s146_s28, 16  ;;  %s2769_s5 = scalar_lea.vmem %s146_s28, 32 }
  0xae   :  { %p2766_p11 = scmp.ne.s32.totalorder %s146_s28, %s2765_s3  ;;  %p2770_p12 = scmp.lt.s32.totalorder %s146_s28, %s146_s28 }
  0xaf   :  { %p2771_p13 = scmp.lt.s32.totalorder %s2769_s5, %s2765_s3 }
  0xb1   :  { %p2772_p0 = por %p2771_p13, %p2770_p12 }
  0xb3   :  { %p2773_p1 = pnand %p2772_p0, %p2766_p11 }
  0xb5   :  { %2776 = shalt.err (!%p2773_p1)
}
  0xb6   :  { %148 = dma.hbm_to_vmem [thread:$0]  %s3440_s19, 16, %s146_s28, [#allocation17]  }
  0xb7   :  { %2821 = dma.done.wait [#allocation5], 256  }
  0xb8   :  { %2822 = vsyncadd [#allocation5], 4294967040 }
  0xb9   :  { %2823 = dma.done.wait [#allocation8], 48  }
  0xba   :  { %2824 = vsyncadd [#allocation8], 4294967248 }
  0xbb   :  { %2825 = dma.done.wait [#allocation11], 32  }
  0xbc   :  { %2826 = vsyncadd [#allocation11], 4294967264 }
  0xbd   :  { %2827 = dma.done.wait [#allocation14], 32  }
  0xbe   :  { %2828 = vsyncadd [#allocation14], 4294967264 }
  0xbf   :  { %2829 = dma.done.wait [#allocation17], 32  }
  0xc0   :  { %2830 = vsyncadd [#allocation17], 4294967264  ;;  %vm189_vm0 = vcmask 261120   ;;  %s3460_s2 = sld [smem:[#allocation33_spill]]  ;;  %v176_v5 = vld [vmem:[#allocation4] sm:$0xff]  ;;  %s3461_s29 = sld [smem:[#allocation35_spill]] }
  0xc1   :  { %2187 = vmatprep.mubr.msk.f32.mxu0 %vm189_vm0, %v176_v5  ;;  %v177_v10 = vld [vmem:[#allocation4 + $0x8] sm:$0xff]  ;;  %v367_v14 = vld [vmem:[%s3429_s8] sm:$0xff]  ;;  %v2055_v17 = vld [vmem:[#allocation9] ss:$0 sm:$0xff]  ;;  %vm471_vm1 = vcmask 1043456   ;;  %s3462_s26 = sld [smem:[#allocation30_spill]] }
  0xc2   :  { %v368_v15 = vld [vmem:[%s3429_s8 + $0x8] sm:$0xff]  ;;  %v369_v24 = vld [vmem:[%s3429_s8 + $0x10] sm:$0xff]  ;;  %v370_v25 = vld [vmem:[%s3429_s8 + $0x18] sm:$0xff]  ;;  %vm464_vm2 = vcmask 31744   ;;  %v2846_v43 = vmov 0.0|0.0   ;;  %vm2847_vm3 = vmmov 0  }
  0xc3   :  { %v2350_v16 = vpack.c.bf16 %v368_v15, %v367_v14  ;;  %v2354_v26 = vpack.c.bf16 %v370_v25, %v369_v24  ;;  %v463_v27 = vld [vmem:[%s3432_s11] sm:$0xf]  ;;  %v460_v30 = vld [vmem:[%s3431_s10 + $0x8] sm:$0xff]  ;;  %v2058_v33 = vld [vmem:[#allocation10] ss:$0 sm:$0xff]  ;;  %v2848_v47 = vmov 0.0  }
  0xc4   :  { %v459_v29 = vld [vmem:[%s3431_s10] sm:$0xff]  ;;  %v646_v41 = vld [vmem:[%s3433_s12 + $0x8] sm:$0xff]  ;;  %v647_v44 = vld [vmem:[%s3433_s12 + $0x10] sm:$0xff]  ;;  %s2849_s30 = smov 32   ;;  %vm550_vm4 = vcmask 130048   ;;  %vm800_vm5 = vcmask 1041409  }
  0xc5   :  { %v2358_v32 = vpack.c.bf16 %v460_v30, %v459_v29  ;;  %v645_v40 = vld [vmem:[%s3433_s12] sm:$0xff]  ;;  %v648_v45 = vld [vmem:[%s3433_s12 + $0x18] sm:$0xff]  ;;  %v643_v50 = vld [vmem:[#allocation7] sm:$0x3]  ;;  %s2850_s12 = smov 64   ;;  %vm794_vm6 = vcmask 253952  }
  0xc6   :  { %v178_v0 = vld [vmem:[%s3460_s2] sm:$0xff]  ;;  %v179_v1 = vld [vmem:[%s3460_s2 + $0x8] sm:$0xff]  ;;  %v180_v2 = vld [vmem:[%s3460_s2 + $0x10] sm:$0xff]  ;;  %v3140_v42 = vpack.c.bf16 %v646_v41, %v645_v40  ;;  %v3152_v46 = vpack.c.bf16 %v648_v45, %v647_v44  ;;  %vm1797_vm7 = vcmask 254976   ;;  %s2852_s3 = smov [#allocation19]   ;;  %s2853_s15 = smov [#allocation20]  }
  0xc7   :  { %v2334_v3 = vpack.c.bf16 %v179_v1, %v178_v0  ;;  %v181_v4 = vld [vmem:[%s3460_s2 + $0x18] sm:$0xff]  ;;  %v273_v7 = vld [vmem:[%s3461_s29] sm:$0xff]  ;;  %v274_v8 = vld [vmem:[%s3461_s29 + $0x8] sm:$0xff]  ;;  %s3463_s2 = sld [smem:[#allocation32_spill]]  ;;  %s2026_s5 = sshll.u32 %s2852_s3, 4  ;;  %s2027_s5 = int_to_ptr.vmem [resolvable:$true] %s2026_s5 }
  0xc8   :  { %v2338_v6 = vpack.c.bf16 %v181_v4, %v180_v2  ;;  %v2342_v9 = vpack.c.bf16 %v274_v8, %v273_v7  ;;  %v275_v11 = vld [vmem:[%s3461_s29 + $0x10] sm:$0xff]  ;;  %v276_v12 = vld [vmem:[%s3461_s29 + $0x18] sm:$0xff]  ;;  %v461_v28 = vld [vmem:[%s3462_s26] sm:$0xff]  ;;  %s2036_s0 = sshll.u32 %s2853_s15, 4  ;;  %p2782_p3 = scmp.lt.s32.totalorder %s2027_s5, %s2027_s5  ;;  %s2037_s0 = int_to_ptr.vmem [resolvable:$true] %s2036_s0 }
  0xc9   :  { %2335 = vmatprep.subr.bf16.mxu0 %v2334_v3  ;;  %v2346_v13 = vpack.c.bf16 %v276_v12, %v275_v11  ;;  %v462_v31 = vld [vmem:[%s3462_s26 + $0x8] sm:$0xff]  ;;  %v2061_v51 = vld [vmem:[#allocation12] ss:$0 sm:$0xff]  ;;  %v2069_v58 = vld [vmem:[#allocation13] ss:$0 sm:$0xff] }
  0xca   :  { %2337 = vmatpush3.bf16.msra.mxu0 %v2334_v3  ;;  %2343 = vmatprep.subr.bf16.mxu1 %v2342_v9 }
  0xcb   :  { %2339 = vmatprep.subr.bf16.mxu0 %v2338_v6  ;;  %2345 = vmatpush3.bf16.msra.mxu1 %v2342_v9 }
  0xcc   :  { %2347 = vmatprep.subr.bf16.mxu1 %v2346_v13 }
  0xcd   :  { %v644_v48 = vld [vmem:[%s3463_s2] sm:$0x3] }
  0xce   :  { %2341 = vmatpush3.bf16.msra.mxu0 %v2338_v6  ;;  %v745_v49 = vrot.slane %v644_v48, 1 }
  0xcf   :  { %2349 = vmatpush3.bf16.msra.mxu1 %v2346_v13  ;;  %2351 = vmatprep.subr.bf16.mxu0 %v2350_v16 }
  0xd0   :  { %2212 = vmatprep.subr.msk.mxu1 %vm471_vm1, %v463_v27  ;;  %748 = vrot.lane.b32.xlu1 %v745_v49, %s2849_s30 }
  0xd1   :  { %2188 = vmatmul.mubr.msk.f32.vlgmr.msra.gmra.mrb[0].mxu0 %vm189_vm0, %v177_v10 }
  0xd2   :  { %2353 = vmatpush3.bf16.msra.mxu0 %v2350_v16 }
  0xd3   :  { %2355 = vmatprep.subr.bf16.mxu0 %v2354_v26 }
  0xd4   :  { %746 = vrot.lane.b32.xlu1 %v644_v48, %s2849_s30 }
  0xd6   :  { %2357 = vmatpush3.bf16.msra.mxu0 %v2354_v26 }
  0xd7   :  { %2362 = vmatprep.subr.bf16.mxu0 %v2846_v43 }
 0x1a4   :  { %v2189_v18 = vpop.f32.mrb[0].mxu0 }
 0x1a5   :  { %v268_v19 = vadd.f32 %v2189_v18, %v2055_v17  ;;  %v262_v20 = vpop.f32.mrb[1].mxu0  ;;  %v749_v18 = vpop.permute.xlu1 %748 }
 0x1a6   :  { %v263_v21 = vadd.f32 %v2055_v17, %v262_v20 }
 0x1a7   :  { %v272_v23 = vmax.f32 %v268_v19, 0.0 }
 0x1a8   :  { %v271_v22 = vmax.f32 %v263_v21, 0.0 }
 0x1a9   :  { %v747_v20 = vpop.permute.xlu1 %746 }
 0x1aa   :  { %2198 = vmatprep.mubr.msk.f32.mxu1 %vm189_vm0, %v271_v22 }
 0x1ab   :  { %2199 = vmatmul.mubr.msk.f32.vlgmr.msra.gmra.mrb[0].mxu1 %vm189_vm0, %v272_v23 }
 0x1ac   :  { %2214 = vmatprep.mubr.msk.f32.mxu1 %vm464_vm2, %v461_v28  ;;  %2213 = vmatpush3.msk.msra.mxu1 %vm471_vm1, %v463_v27 }
 0x1ad   :  { %2359 = vmatprep.subr.bf16.mxu1 %v2358_v32 }
 0x1af   :  { %2215 = vmatmul.mubr.msk.f32.vlgmr.msra.gmra.mrb[2].mxu1 %vm464_vm2, %v462_v31 }
 0x1b0   :  { %2361 = vmatpush3.bf16.msra.mxu1 %v2358_v32 }
 0x1b1   :  { %2368 = vmatprep.subr.bf16.mxu1 %v2846_v43 }
 0x27e   :  { %v2200_v34 = vpop.f32.mrb[0].mxu1 }
 0x27f   :  { %v362_v35 = vadd.f32 %v2200_v34, %v2058_v33  ;;  %v356_v36 = vpop.f32.mrb[1].mxu1 }
 0x280   :  { %v357_v37 = vadd.f32 %v2058_v33, %v356_v36 }
 0x281   :  { %v366_v39 = vmax.f32 %v362_v35, 0.0 }
 0x282   :  { %v365_v38 = vmax.f32 %v357_v37, 0.0 }
 0x284   :  { %2209 = vmatprep.mubr.msk.f32.mxu0 %vm189_vm0, %v365_v38 }
 0x285   :  { %2210 = vmatmul.mubr.msk.f32.vlgmr.msra.gmra.mrb[2].mxu0 %vm189_vm0, %v366_v39 }
 0x286   :  { %2364 = vmatpush3.bf16.msra.mxu0 %v3140_v42  ;;  %2232 = vmatprep.mubr.msk.f32.mxu0 %vm2847_vm3, %v2848_v47 }
 0x287   :  { %2365 = vmatprep.subr.bf16.mxu0 %v2846_v43 }
 0x28a   :  { %2367 = vmatpush3.bf16.msra.mxu0 %v3152_v46 }
 0x28b   :  { %2374 = vmatprep.subr.bf16.mxu0 %v2846_v43 }
 0x28d   :  { %2233 = vmatmul.mubr.msk.f32.vlgmr.msra.gmra.mrb[4].mxu0 %vm189_vm0, %v643_v50 }
 0x28e   :  { %2376 = vmatpush3.bf16.msra.mxu0 %v3140_v42  ;;  %2254 = vmatprep.mubr.msk.f32.mxu0 %vm2847_vm3, %v2848_v47 }
 0x28f   :  { %2377 = vmatprep.subr.bf16.mxu0 %v2846_v43 }
 0x292   :  { %2379 = vmatpush3.bf16.msra.mxu0 %v3152_v46 }
 0x293   :  { %2386 = vmatprep.subr.bf16.mxu0 %v2846_v43 }
 0x358   :  { %v2211_v52 = vpop.f32.mrb[2].mxu0 }
 0x359   :  { %v450_v53 = vpop.f32.mrb[3].mxu0  ;;  %v456_v55 = vadd.f32 %v2211_v52, %v2061_v51 }
 0x35a   :  { %v451_v54 = vadd.f32 %v2061_v51, %v450_v53 }
 0x35c   :  { %2221 = vmatprep.mubr.msk.f32.mxu1 %vm550_vm4, %v451_v54 }
 0x35d   :  { %2222 = vmatmul.mubr.msk.f32.vlgmr.msra.gmra.mrb[2].mxu1 %vm550_vm4, %v456_v55 }
 0x35e   :  { %2370 = vmatpush3.bf16.msra.mxu1 %v3140_v42  ;;  %2243 = vmatprep.mubr.msk.f32.mxu1 %vm2847_vm3, %v2848_v47 }
 0x35f   :  { %2371 = vmatprep.subr.bf16.mxu1 %v2846_v43 }
 0x360   :  { %v720_v56 = vpop.f32.mrb[4].mxu0 }
 0x361   :  { %v2234_v57 = vpop.f32.mrb[5].mxu0  ;;  %v725_v63 = vrot.slane %v720_v56, 1 }
 0x362   :  { %2373 = vmatpush3.bf16.msra.mxu1 %v3152_v46 }
 0x363   :  { %2380 = vmatprep.subr.bf16.mxu1 %v2846_v43 }
 0x430   :  { %v2223_v59 = vpop.f32.mrb[2].mxu1 }
 0x431   :  { %v640_v60 = vadd.f32 %v2223_v59, %v2069_v58  ;;  %v623_v61 = vpop.f32.mrb[3].mxu1 }
 0x432   :  { %v639_v62 = vadd.f32 %v2069_v58, %v623_v61 }
 0x433   :  { %642 = vst [vmem:[#allocation2 + $0x8] sm:$0xff] %v640_v60 }
 0x434   :  { %641 = vst [vmem:[#allocation2] sm:$0xff] %v639_v62 }
 0x43a   :  { %v650_v0 = vld [vmem:[#allocation2 + $0x8] sm:$0x1]  ;;  %v798_v40 = vld [vmem:[#allocation2 + $0x9] sm:$0x1] }
 0x43b   :  { %v649_v1 = vld [vmem:[#allocation2] sm:$0x1]  ;;  %v729_v2 = vadd.f32 %v725_v63, %v650_v0  ;;  %v797_v35 = vld [vmem:[#allocation2 + $0x1] sm:$0x1] }
 0x43c   :  { %v728_v3 = vadd.f32 %v720_v56, %v649_v1 }
 0x43d   :  { %2447 = vtanh.f32 %v729_v2  ;;  %v2072_v6 = vmul.f32 -1.442695, %v729_v2 }
 0x43e   :  { %2449 = vtanh.f32 %v728_v3  ;;  %v2071_v7 = vmul.f32 -1.442695, %v728_v3 }
 0x43f   :  { %2451 = vpow2.f32 %v2072_v6 }
 0x440   :  { %2453 = vpow2.f32 %v2071_v7 }
 0x447   :  { %v2448_v4 = vpop.eup %2447 }
 0x448   :  { %758 = vrot.lane.b32.xlu0 %v2448_v4, %s2850_s12  ;;  %v2450_v5 = vpop.eup %2449 }
 0x449   :  { %v2452_v8 = vpop.eup %2451 }
 0x44a   :  { %v737_v9 = vadd.f32 1.0, %v2452_v8  ;;  %v2454_v10 = vpop.eup %2453 }
 0x44b   :  { %v736_v11 = vadd.f32 1.0, %v2454_v10 }
 0x44c   :  { %756 = vrot.lane.b32.xlu0 %v2450_v5, %s2850_s12  ;;  %2455 = vrcp.f32 %v737_v9 }
 0x44d   :  { %2457 = vrcp.f32 %v736_v11  ;;  %v940_v11 = vld [vmem:[#allocation2 + $0x2] sm:$0x1] }
 0x456   :  { %v2456_v12 = vpop.eup %2455 }
 0x457   :  { %v2458_v15 = vpop.eup %2457  ;;  %v753_v19 = vmul.f32 %v2456_v12, %v749_v18 }
 0x458   :  { %v752_v23 = vmul.f32 %v2458_v15, %v747_v20 }
 0x4ba   :  { %v759_v13 = vpop.permute.xlu0 %758 }
 0x4bb   :  { %v763_v14 = vmul.f32 %v2456_v12, %v759_v13 }
 0x4bd   :  { %768 = vrot.lane.b32.xlu0 %v763_v14, %s2849_s30 }
 0x4be   :  { %v757_v16 = vpop.permute.xlu0 %756 }
 0x4bf   :  { %v762_v17 = vmul.f32 %v2458_v15, %v757_v16  ;;  %v941_v16 = vld [vmem:[#allocation2 + $0xa] sm:$0x1] }
 0x4c1   :  { %766 = vrot.lane.b32.xlu1 %v762_v17, %s2849_s30 }
 0x52f   :  { %v769_v21 = vpop.permute.xlu0 %768 }
 0x530   :  { %v773_v22 = vadd.f32 %v769_v21, %v753_v19 }
 0x532   :  { %2459 = vtanh.f32 %v773_v22 }
 0x533   :  { %v767_v24 = vpop.permute.xlu1 %766 }
 0x534   :  { %v772_v25 = vadd.f32 %v767_v24, %v752_v23 }
 0x536   :  { %2461 = vtanh.f32 %v772_v25 }
 0x53c   :  { %v2460_v26 = vpop.eup %2459 }
 0x53d   :  { %780 = vrot.lane.b32.xlu0 %v2460_v26, %s2850_s12 }
 0x540   :  { %v2462_v27 = vpop.eup %2461 }
 0x541   :  { %778 = vrot.lane.b32.xlu1 %v2462_v27, %s2850_s12 }
 0x5af   :  { %v781_v28 = vpop.permute.xlu0 %780 }
 0x5b0   :  { %v3182_v29 = vmul.f32 %v2456_v12, %v781_v28 }
 0x5b2   :  { %v799_v31 = vrot.slane %v3182_v29, 7 }
 0x5b3   :  { %v779_v30 = vpop.permute.xlu1 %778 }
 0x5b4   :  { %v3185_v32 = vmul.f32 %v2458_v15, %v779_v30 }
 0x5b6   :  { %v801_v33 = vsel %vm800_vm5, %v799_v31, %v3185_v32 }
 0x5b7   :  { %802 = vrot.lane.b32.xlu0 %v801_v33, %s2849_s30 }
 0x629   :  { %v803_v34 = vpop.permute.xlu0 %802 }
 0x62a   :  { %2244 = vmatmul.mubr.msk.f32.vlgmr.msra.gmra.mrb[4].mxu1 %vm189_vm0, %v803_v34 }
 0x62b   :  { %2382 = vmatpush3.bf16.msra.mxu1 %v3140_v42  ;;  %2265 = vmatprep.mubr.msk.f32.mxu1 %vm2847_vm3, %v2848_v47 }
 0x62c   :  { %2383 = vmatprep.subr.bf16.mxu1 %v2846_v43 }
 0x62f   :  { %2385 = vmatpush3.bf16.msra.mxu1 %v3152_v46 }
 0x630   :  { %2392 = vmatprep.subr.bf16.mxu1 %v2846_v43 }
 0x6fd   :  { %v872_v36 = vpop.f32.mrb[4].mxu1 }
 0x6fe   :  { %v877_v37 = vrot.slane %v872_v36, 1  ;;  %v880_v38 = vadd.f32 %v872_v36, %v797_v35  ;;  %v2245_v39 = vpop.f32.mrb[5].mxu1 }
 0x700   :  { %v881_v41 = vadd.f32 %v877_v37, %v798_v40  ;;  %2463 = vtanh.f32 %v880_v38  ;;  %v2074_v48 = vmul.f32 -1.442695, %v880_v38 }
 0x702   :  { %2465 = vtanh.f32 %v881_v41  ;;  %v2075_v49 = vmul.f32 -1.442695, %v881_v41 }
 0x703   :  { %2467 = vpow2.f32 %v2074_v48 }
 0x704   :  { %2469 = vpow2.f32 %v2075_v49 }
 0x70a   :  { %v2464_v44 = vpop.eup %2463 }
 0x70b   :  { %900 = vrot.lane.b32.xlu0 %v2464_v44, %s2850_s12 }
 0x70c   :  { %v2466_v45 = vpop.eup %2465 }
 0x70d   :  { %902 = vrot.lane.b32.xlu1 %v2466_v45, %s2850_s12  ;;  %v2468_v50 = vpop.eup %2467 }
 0x70e   :  { %v2470_v51 = vpop.eup %2469  ;;  %v888_v52 = vadd.f32 1.0, %v2468_v50 }
 0x70f   :  { %v889_v53 = vadd.f32 1.0, %v2470_v51 }
 0x710   :  { %2471 = vrcp.f32 %v888_v52 }
 0x711   :  { %2473 = vrcp.f32 %v889_v53  ;;  %v1082_v53 = vld [vmem:[#allocation2 + $0x3] sm:$0x1] }
 0x71a   :  { %v2472_v54 = vpop.eup %2471 }
 0x71b   :  { %v2474_v57 = vpop.eup %2473  ;;  %v896_v60 = vmul.f32 %v2472_v54, %v772_v25 }
 0x71c   :  { %v897_v63 = vmul.f32 %v2474_v57, %v773_v22 }
 0x77d   :  { %v901_v55 = vpop.permute.xlu0 %900 }
 0x77e   :  { %v906_v56 = vmul.f32 %v2472_v54, %v901_v55 }
 0x77f   :  { %v903_v58 = vpop.permute.xlu1 %902 }
 0x780   :  { %910 = vrot.lane.b32.xlu0 %v906_v56, %s2849_s30  ;;  %v907_v59 = vmul.f32 %v2474_v57, %v903_v58  ;;  %v1083_v58 = vld [vmem:[#allocation2 + $0xb] sm:$0x1] }
 0x782   :  { %912 = vrot.lane.b32.xlu1 %v907_v59, %s2849_s30 }
 0x7f2   :  { %v911_v61 = vpop.permute.xlu0 %910 }
 0x7f3   :  { %v916_v62 = vadd.f32 %v911_v61, %v896_v60 }
 0x7f4   :  { %v913_v0 = vpop.permute.xlu1 %912 }
 0x7f5   :  { %2475 = vtanh.f32 %v916_v62  ;;  %v917_v1 = vadd.f32 %v913_v0, %v897_v63 }
 0x7f7   :  { %2477 = vtanh.f32 %v917_v1 }
 0x7ff   :  { %v2476_v2 = vpop.eup %2475 }
 0x800   :  { %922 = vrot.lane.b32.xlu0 %v2476_v2, %s2850_s12 }
 0x801   :  { %v2478_v3 = vpop.eup %2477 }
 0x802   :  { %924 = vrot.lane.b32.xlu1 %v2478_v3, %s2850_s12 }
 0x872   :  { %v923_v4 = vpop.permute.xlu0 %922 }
 0x873   :  { %v3205_v7 = vmul.f32 %v2472_v54, %v923_v4 }
 0x874   :  { %v925_v5 = vpop.permute.xlu1 %924 }
 0x875   :  { %v3203_v6 = vmul.f32 %v2474_v57, %v925_v5 }
 0x877   :  { %v942_v8 = vrot.slane %v3203_v6, 7 }
 0x879   :  { %v943_v9 = vsel %vm800_vm5, %v942_v8, %v3205_v7 }
 0x87a   :  { %944 = vrot.lane.b32.xlu1 %v943_v9, %s2849_s30 }
 0x8ec   :  { %v945_v10 = vpop.permute.xlu1 %944 }
 0x8ed   :  { %2255 = vmatmul.mubr.msk.f32.vlgmr.msra.gmra.mrb[6].mxu0 %vm189_vm0, %v945_v10 }
 0x8ee   :  { %2388 = vmatpush3.bf16.msra.mxu0 %v3140_v42  ;;  %2276 = vmatprep.mubr.msk.f32.mxu0 %vm2847_vm3, %v2848_v47 }
 0x8ef   :  { %2389 = vmatprep.subr.bf16.mxu0 %v2846_v43 }
 0x8f2   :  { %2391 = vmatpush3.bf16.msra.mxu0 %v3152_v46 }
 0x8f3   :  { %2398 = vmatprep.subr.bf16.mxu0 %v2846_v43 }
 0x9c0   :  { %v1014_v12 = vpop.f32.mrb[6].mxu0 }
 0x9c1   :  { %v1019_v13 = vrot.slane %v1014_v12, 1  ;;  %v1022_v14 = vadd.f32 %v1014_v12, %v940_v11  ;;  %v2256_v15 = vpop.f32.mrb[7].mxu0 }
 0x9c3   :  { %v1023_v17 = vadd.f32 %v1019_v13, %v941_v16  ;;  %2479 = vtanh.f32 %v1022_v14  ;;  %v2077_v20 = vmul.f32 -1.442695, %v1022_v14 }
 0x9c5   :  { %2481 = vtanh.f32 %v1023_v17  ;;  %v2078_v21 = vmul.f32 -1.442695, %v1023_v17 }
 0x9c6   :  { %2483 = vpow2.f32 %v2077_v20 }
 0x9c7   :  { %2485 = vpow2.f32 %v2078_v21 }
 0x9cd   :  { %v2480_v18 = vpop.eup %2479 }
 0x9ce   :  { %1042 = vrot.lane.b32.xlu1 %v2480_v18, %s2850_s12 }
 0x9cf   :  { %v2482_v19 = vpop.eup %2481 }
 0x9d0   :  { %1044 = vrot.lane.b32.xlu0 %v2482_v19, %s2850_s12  ;;  %v2484_v22 = vpop.eup %2483 }
 0x9d1   :  { %v2486_v23 = vpop.eup %2485  ;;  %v1030_v24 = vadd.f32 1.0, %v2484_v22 }
 0x9d2   :  { %v1031_v25 = vadd.f32 1.0, %v2486_v23 }
 0x9d3   :  { %2487 = vrcp.f32 %v1030_v24 }
 0x9d4   :  { %2489 = vrcp.f32 %v1031_v25 }
 0x9dd   :  { %v2488_v26 = vpop.eup %2487 }
 0x9de   :  { %v2490_v30 = vpop.eup %2489  ;;  %v1038_v34 = vmul.f32 %v2488_v26, %v916_v62 }
 0x9df   :  { %v1039_v37 = vmul.f32 %v2490_v30, %v917_v1 }
 0xa40   :  { %v1043_v27 = vpop.permute.xlu1 %1042 }
 0xa41   :  { %v1048_v28 = vmul.f32 %v2488_v26, %v1043_v27  ;;  %v1224_v27 = vld [vmem:[#allocation2 + $0x4] sm:$0x1] }
 0xa42   :  { %v1045_v31 = vpop.permute.xlu0 %1044 }
 0xa43   :  { %1052 = vrot.lane.b32.xlu1 %v1048_v28, %s2849_s30  ;;  %v1049_v33 = vmul.f32 %v2490_v30, %v1045_v31 }
 0xa45   :  { %1054 = vrot.lane.b32.xlu0 %v1049_v33, %s2849_s30 }
 0xab5   :  { %v1053_v35 = vpop.permute.xlu1 %1052 }
 0xab6   :  { %v1058_v36 = vadd.f32 %v1053_v35, %v1038_v34  ;;  %v1225_v34 = vld [vmem:[#allocation2 + $0xc] sm:$0x1] }
 0xab7   :  { %v1055_v38 = vpop.permute.xlu0 %1054 }
 0xab8   :  { %2491 = vtanh.f32 %v1058_v36  ;;  %v1059_v39 = vadd.f32 %v1055_v38, %v1039_v37 }
 0xaba   :  { %2493 = vtanh.f32 %v1059_v39 }
 0xac2   :  { %v2492_v40 = vpop.eup %2491 }
 0xac3   :  { %1064 = vrot.lane.b32.xlu1 %v2492_v40, %s2850_s12 }
 0xac4   :  { %v2494_v41 = vpop.eup %2493 }
 0xac5   :  { %1066 = vrot.lane.b32.xlu0 %v2494_v41, %s2850_s12 }
 0xb35   :  { %v1065_v44 = vpop.permute.xlu1 %1064 }
 0xb36   :  { %v3226_v49 = vmul.f32 %v2488_v26, %v1065_v44 }
 0xb37   :  { %v1067_v45 = vpop.permute.xlu0 %1066 }
 0xb38   :  { %v3224_v48 = vmul.f32 %v2490_v30, %v1067_v45 }
 0xb3a   :  { %v1084_v50 = vrot.slane %v3224_v48, 7 }
 0xb3c   :  { %v1085_v51 = vsel %vm800_vm5, %v1084_v50, %v3226_v49 }
 0xb3d   :  { %1086 = vrot.lane.b32.xlu0 %v1085_v51, %s2849_s30 }
 0xbaf   :  { %v1087_v52 = vpop.permute.xlu0 %1086 }
 0xbb0   :  { %2266 = vmatmul.mubr.msk.f32.vlgmr.msra.gmra.mrb[6].mxu1 %vm189_vm0, %v1087_v52 }
 0xbb1   :  { %2394 = vmatpush3.bf16.msra.mxu1 %v3140_v42  ;;  %2287 = vmatprep.mubr.msk.f32.mxu1 %vm2847_vm3, %v2848_v47 }
 0xbb2   :  { %2395 = vmatprep.subr.bf16.mxu1 %v2846_v43 }
 0xbb5   :  { %2397 = vmatpush3.bf16.msra.mxu1 %v3152_v46 }
 0xbb6   :  { %2404 = vmatprep.subr.bf16.mxu1 %v2846_v43 }
 0xc83   :  { %v1156_v54 = vpop.f32.mrb[6].mxu1 }
 0xc84   :  { %v1161_v55 = vrot.slane %v1156_v54, 1  ;;  %v1164_v56 = vadd.f32 %v1156_v54, %v1082_v53  ;;  %v2267_v57 = vpop.f32.mrb[7].mxu1 }
 0xc86   :  { %v1165_v59 = vadd.f32 %v1161_v55, %v1083_v58  ;;  %2495 = vtanh.f32 %v1164_v56  ;;  %v2080_v62 = vmul.f32 -1.442695, %v1164_v56 }
 0xc88   :  { %2497 = vtanh.f32 %v1165_v59  ;;  %v2081_v63 = vmul.f32 -1.442695, %v1165_v59 }
 0xc89   :  { %2499 = vpow2.f32 %v2080_v62 }
 0xc8a   :  { %2501 = vpow2.f32 %v2081_v63 }
 0xc90   :  { %v2496_v60 = vpop.eup %2495 }
 0xc91   :  { %1184 = vrot.lane.b32.xlu0 %v2496_v60, %s2850_s12 }
 0xc92   :  { %v2498_v61 = vpop.eup %2497 }
 0xc93   :  { %1186 = vrot.lane.b32.xlu1 %v2498_v61, %s2850_s12  ;;  %v2500_v0 = vpop.eup %2499 }
 0xc94   :  { %v2502_v1 = vpop.eup %2501  ;;  %v1172_v2 = vadd.f32 1.0, %v2500_v0 }
 0xc95   :  { %v1173_v3 = vadd.f32 1.0, %v2502_v1 }
 0xc96   :  { %2503 = vrcp.f32 %v1172_v2 }
 0xc97   :  { %2505 = vrcp.f32 %v1173_v3 }
 0xca0   :  { %v2504_v4 = vpop.eup %2503 }
 0xca1   :  { %v2506_v9 = vpop.eup %2505  ;;  %v1180_v12 = vmul.f32 %v2504_v4, %v1058_v36 }
 0xca2   :  { %v1181_v15 = vmul.f32 %v2506_v9, %v1059_v39 }
 0xd03   :  { %v1185_v5 = vpop.permute.xlu0 %1184 }
 0xd04   :  { %v1190_v8 = vmul.f32 %v2504_v4, %v1185_v5 }
 0xd05   :  { %v1187_v10 = vpop.permute.xlu1 %1186 }
 0xd06   :  { %1194 = vrot.lane.b32.xlu0 %v1190_v8, %s2849_s30  ;;  %v1191_v11 = vmul.f32 %v2506_v9, %v1187_v10 }
 0xd08   :  { %1196 = vrot.lane.b32.xlu1 %v1191_v11, %s2849_s30 }
 0xd78   :  { %v1195_v13 = vpop.permute.xlu0 %1194 }
 0xd79   :  { %v1200_v14 = vadd.f32 %v1195_v13, %v1180_v12 }
 0xd7a   :  { %v1197_v16 = vpop.permute.xlu1 %1196 }
 0xd7b   :  { %2507 = vtanh.f32 %v1200_v14  ;;  %v1201_v17 = vadd.f32 %v1197_v16, %v1181_v15 }
 0xd7d   :  { %2509 = vtanh.f32 %v1201_v17 }
 0xd85   :  { %v2508_v18 = vpop.eup %2507 }
 0xd86   :  { %1206 = vrot.lane.b32.xlu0 %v2508_v18, %s2850_s12 }
 0xd87   :  { %v2510_v19 = vpop.eup %2509 }
 0xd88   :  { %1208 = vrot.lane.b32.xlu1 %v2510_v19, %s2850_s12 }
 0xdf8   :  { %v1207_v20 = vpop.permute.xlu0 %1206 }
 0xdf9   :  { %v3247_v23 = vmul.f32 %v2504_v4, %v1207_v20 }
 0xdfa   :  { %v1209_v21 = vpop.permute.xlu1 %1208 }
 0xdfb   :  { %v3245_v22 = vmul.f32 %v2506_v9, %v1209_v21  ;;  %v1366_v9 = vld [vmem:[#allocation2 + $0x5] sm:$0x1] }
 0xdfd   :  { %v1226_v24 = vrot.slane %v3245_v22, 7 }
 0xdff   :  { %v1227_v25 = vsel %vm800_vm5, %v1226_v24, %v3247_v23 }
 0xe00   :  { %1228 = vrot.lane.b32.xlu1 %v1227_v25, %s2849_s30 }
 0xe72   :  { %v1229_v26 = vpop.permute.xlu1 %1228 }
 0xe73   :  { %2277 = vmatmul.mubr.msk.f32.vlgmr.msra.gmra.mrb[8].mxu0 %vm189_vm0, %v1229_v26 }
 0xe74   :  { %2400 = vmatpush3.bf16.msra.mxu0 %v3140_v42  ;;  %2298 = vmatprep.mubr.msk.f32.mxu0 %vm2847_vm3, %v2848_v47 }
 0xe75   :  { %2401 = vmatprep.subr.bf16.mxu0 %v2846_v43 }
 0xe78   :  { %2403 = vmatpush3.bf16.msra.mxu0 %v3152_v46 }
 0xf46   :  { %v1298_v28 = vpop.f32.mrb[8].mxu0 }
 0xf47   :  { %v1303_v30 = vrot.slane %v1298_v28, 1  ;;  %v1306_v31 = vadd.f32 %v1298_v28, %v1224_v27  ;;  %v2278_v33 = vpop.f32.mrb[9].mxu0 }
 0xf49   :  { %v1307_v35 = vadd.f32 %v1303_v30, %v1225_v34  ;;  %2511 = vtanh.f32 %v1306_v31  ;;  %v2083_v38 = vmul.f32 -1.442695, %v1306_v31 }
 0xf4b   :  { %2513 = vtanh.f32 %v1307_v35  ;;  %v2084_v39 = vmul.f32 -1.442695, %v1307_v35 }
 0xf4c   :  { %2515 = vpow2.f32 %v2083_v38 }
 0xf4d   :  { %2517 = vpow2.f32 %v2084_v39 }
 0xf53   :  { %v2512_v36 = vpop.eup %2511 }
 0xf54   :  { %1326 = vrot.lane.b32.xlu1 %v2512_v36, %s2850_s12 }
 0xf55   :  { %v2514_v37 = vpop.eup %2513 }
 0xf56   :  { %1328 = vrot.lane.b32.xlu0 %v2514_v37, %s2850_s12  ;;  %v2516_v40 = vpop.eup %2515 }
 0xf57   :  { %v2518_v41 = vpop.eup %2517  ;;  %v1314_v44 = vadd.f32 1.0, %v2516_v40 }
 0xf58   :  { %v1315_v45 = vadd.f32 1.0, %v2518_v41 }
 0xf59   :  { %2519 = vrcp.f32 %v1314_v44 }
 0xf5a   :  { %2521 = vrcp.f32 %v1315_v45 }
 0xf63   :  { %v2520_v50 = vpop.eup %2519 }
 0xf64   :  { %v2522_v53 = vpop.eup %2521  ;;  %v1322_v56 = vmul.f32 %v2520_v50, %v1200_v14  ;;  %v1367_v14 = vld [vmem:[#allocation2 + $0xd] sm:$0x1] }
 0xf65   :  { %v1323_v59 = vmul.f32 %v2522_v53, %v1201_v17 }
 0xfc6   :  { %v1327_v51 = vpop.permute.xlu1 %1326 }
 0xfc7   :  { %v1332_v52 = vmul.f32 %v2520_v50, %v1327_v51  ;;  %v1508_v51 = vld [vmem:[#allocation2 + $0x6] sm:$0x1] }
 0xfc8   :  { %v1329_v54 = vpop.permute.xlu0 %1328 }
 0xfc9   :  { %1336 = vrot.lane.b32.xlu1 %v1332_v52, %s2849_s30  ;;  %v1333_v55 = vmul.f32 %v2522_v53, %v1329_v54 }
 0xfcb   :  { %1338 = vrot.lane.b32.xlu0 %v1333_v55, %s2849_s30 }
0x103b   :  { %v1337_v57 = vpop.permute.xlu1 %1336 }
0x103c   :  { %v1342_v58 = vadd.f32 %v1337_v57, %v1322_v56  ;;  %v1509_v56 = vld [vmem:[#allocation2 + $0xe] sm:$0x1] }
0x103d   :  { %v1339_v60 = vpop.permute.xlu0 %1338 }
0x103e   :  { %2523 = vtanh.f32 %v1342_v58  ;;  %v1343_v61 = vadd.f32 %v1339_v60, %v1323_v59 }
0x1040   :  { %2525 = vtanh.f32 %v1343_v61 }
0x1048   :  { %v2524_v62 = vpop.eup %2523 }
0x1049   :  { %1348 = vrot.lane.b32.xlu1 %v2524_v62, %s2850_s12 }
0x104a   :  { %v2526_v63 = vpop.eup %2525 }
0x104b   :  { %1350 = vrot.lane.b32.xlu0 %v2526_v63, %s2850_s12 }
0x10bb   :  { %v1349_v0 = vpop.permute.xlu1 %1348 }
0x10bc   :  { %v3267_v3 = vmul.f32 %v2520_v50, %v1349_v0 }
0x10bd   :  { %v1351_v1 = vpop.permute.xlu0 %1350 }
0x10be   :  { %v3265_v2 = vmul.f32 %v2522_v53, %v1351_v1 }
0x10c0   :  { %v1368_v4 = vrot.slane %v3265_v2, 7 }
0x10c2   :  { %v1369_v5 = vsel %vm800_vm5, %v1368_v4, %v3267_v3 }
0x10c3   :  { %1370 = vrot.lane.b32.xlu0 %v1369_v5, %s2849_s30 }
0x1135   :  { %v1371_v8 = vpop.permute.xlu0 %1370 }
0x1136   :  { %2288 = vmatmul.mubr.msk.f32.vlgmr.msra.gmra.mrb[8].mxu1 %vm189_vm0, %v1371_v8 }
0x1137   :  { %2406 = vmatpush3.bf16.msra.mxu1 %v3140_v42  ;;  %2309 = vmatprep.mubr.msk.f32.mxu1 %vm2847_vm3, %v2848_v47 }
0x1138   :  { %2407 = vmatprep.subr.bf16.mxu1 %v2846_v43 }
0x113b   :  { %2409 = vmatpush3.bf16.msra.mxu1 %v3152_v46 }
0x1209   :  { %v1440_v10 = vpop.f32.mrb[8].mxu1 }
0x120a   :  { %v1445_v11 = vrot.slane %v1440_v10, 1  ;;  %v1448_v12 = vadd.f32 %v1440_v10, %v1366_v9  ;;  %v2289_v13 = vpop.f32.mrb[9].mxu1 }
0x120c   :  { %v1449_v15 = vadd.f32 %v1445_v11, %v1367_v14  ;;  %2527 = vtanh.f32 %v1448_v12  ;;  %v2086_v47 = vmul.f32 -1.442695, %v1448_v12 }
0x120e   :  { %2529 = vtanh.f32 %v1449_v15  ;;  %v2087_v17 = vmul.f32 -1.442695, %v1449_v15 }
0x120f   :  { %2531 = vpow2.f32 %v2086_v47 }
0x1210   :  { %2533 = vpow2.f32 %v2087_v17 }
0x1216   :  { %v2528_v16 = vpop.eup %2527 }
0x1217   :  { %1468 = vrot.lane.b32.xlu0 %v2528_v16, %s2850_s12 }
0x1218   :  { %v2530_v42 = vpop.eup %2529 }
0x1219   :  { %1470 = vrot.lane.b32.xlu1 %v2530_v42, %s2850_s12  ;;  %v2532_v43 = vpop.eup %2531 }
0x121a   :  { %v2534_v46 = vpop.eup %2533  ;;  %v1456_v18 = vadd.f32 1.0, %v2532_v43 }
0x121b   :  { %v1457_v19 = vadd.f32 1.0, %v2534_v46 }
0x121c   :  { %2535 = vrcp.f32 %v1456_v18 }
0x121d   :  { %2537 = vrcp.f32 %v1457_v19 }
0x1226   :  { %v2536_v20 = vpop.eup %2535 }
0x1227   :  { %v2538_v25 = vpop.eup %2537  ;;  %v1464_v28 = vmul.f32 %v2536_v20, %v1342_v58 }
0x1228   :  { %v1465_v33 = vmul.f32 %v2538_v25, %v1343_v61 }
0x1289   :  { %v1469_v21 = vpop.permute.xlu0 %1468 }
0x128a   :  { %v1474_v24 = vmul.f32 %v2536_v20, %v1469_v21 }
0x128b   :  { %v1471_v26 = vpop.permute.xlu1 %1470 }
0x128c   :  { %1478 = vrot.lane.b32.xlu0 %v1474_v24, %s2849_s30  ;;  %v1475_v27 = vmul.f32 %v2538_v25, %v1471_v26 }
0x128e   :  { %1480 = vrot.lane.b32.xlu1 %v1475_v27, %s2849_s30 }
0x12fe   :  { %v1479_v30 = vpop.permute.xlu0 %1478 }
0x12ff   :  { %v1484_v31 = vadd.f32 %v1479_v30, %v1464_v28 }
0x1300   :  { %v1481_v34 = vpop.permute.xlu1 %1480 }
0x1301   :  { %2539 = vtanh.f32 %v1484_v31  ;;  %v1485_v35 = vadd.f32 %v1481_v34, %v1465_v33 }
0x1303   :  { %2541 = vtanh.f32 %v1485_v35 }
0x130b   :  { %v2540_v36 = vpop.eup %2539 }
0x130c   :  { %1490 = vrot.lane.b32.xlu0 %v2540_v36, %s2850_s12 }
0x130d   :  { %v2542_v37 = vpop.eup %2541 }
0x130e   :  { %1492 = vrot.lane.b32.xlu1 %v2542_v37, %s2850_s12 }
0x137e   :  { %v1491_v38 = vpop.permute.xlu0 %1490 }
0x137f   :  { %v3287_v41 = vmul.f32 %v2536_v20, %v1491_v38 }
0x1380   :  { %v1493_v39 = vpop.permute.xlu1 %1492 }
0x1381   :  { %v3285_v40 = vmul.f32 %v2538_v25, %v1493_v39  ;;  %v1650_v25 = vld [vmem:[#allocation2 + $0x7] sm:$0x1] }
0x1383   :  { %v1510_v44 = vrot.slane %v3285_v40, 7 }
0x1385   :  { %v1511_v45 = vsel %vm800_vm5, %v1510_v44, %v3287_v41 }
0x1386   :  { %1512 = vrot.lane.b32.xlu1 %v1511_v45, %s2849_s30 }
0x13f8   :  { %v1513_v50 = vpop.permute.xlu1 %1512 }
0x13f9   :  { %2299 = vmatmul.mubr.msk.f32.vlgmr.msra.gmra.mrb[10].mxu0 %vm189_vm0, %v1513_v50 }
0x14cc   :  { %v1582_v52 = vpop.f32.mrb[10].mxu0 }
0x14cd   :  { %v1587_v53 = vrot.slane %v1582_v52, 1  ;;  %v1590_v54 = vadd.f32 %v1582_v52, %v1508_v51  ;;  %v2300_v55 = vpop.f32.mrb[11].mxu0 }
0x14cf   :  { %v1591_v57 = vadd.f32 %v1587_v53, %v1509_v56  ;;  %2543 = vtanh.f32 %v1590_v54  ;;  %v2089_v60 = vmul.f32 -1.442695, %v1590_v54 }
0x14d1   :  { %2545 = vtanh.f32 %v1591_v57  ;;  %v2090_v61 = vmul.f32 -1.442695, %v1591_v57 }
0x14d2   :  { %2547 = vpow2.f32 %v2089_v60 }
0x14d3   :  { %2549 = vpow2.f32 %v2090_v61 }
0x14d9   :  { %v2544_v58 = vpop.eup %2543 }
0x14da   :  { %1610 = vrot.lane.b32.xlu1 %v2544_v58, %s2850_s12 }
0x14db   :  { %v2546_v59 = vpop.eup %2545 }
0x14dc   :  { %1612 = vrot.lane.b32.xlu0 %v2546_v59, %s2850_s12  ;;  %v2548_v62 = vpop.eup %2547 }
0x14dd   :  { %v2550_v63 = vpop.eup %2549  ;;  %v1598_v0 = vadd.f32 1.0, %v2548_v62 }
0x14de   :  { %v1599_v1 = vadd.f32 1.0, %v2550_v63 }
0x14df   :  { %2551 = vrcp.f32 %v1598_v0 }
0x14e0   :  { %2553 = vrcp.f32 %v1599_v1 }
0x14e9   :  { %v2552_v4 = vpop.eup %2551 }
0x14ea   :  { %v2554_v9 = vpop.eup %2553  ;;  %v1606_v12 = vmul.f32 %v2552_v4, %v1484_v31  ;;  %v1651_v31 = vld [vmem:[#allocation2 + $0xf] sm:$0x1] }
0x14eb   :  { %v1607_v15 = vmul.f32 %v2554_v9, %v1485_v35 }
0x154c   :  { %v1611_v5 = vpop.permute.xlu1 %1610 }
0x154d   :  { %v1616_v8 = vmul.f32 %v2552_v4, %v1611_v5 }
0x154e   :  { %v1613_v10 = vpop.permute.xlu0 %1612 }
0x154f   :  { %1620 = vrot.lane.b32.xlu1 %v1616_v8, %s2849_s30  ;;  %v1617_v11 = vmul.f32 %v2554_v9, %v1613_v10 }
0x1551   :  { %1622 = vrot.lane.b32.xlu0 %v1617_v11, %s2849_s30 }
0x15c1   :  { %v1621_v13 = vpop.permute.xlu1 %1620 }
0x15c2   :  { %v1626_v14 = vadd.f32 %v1621_v13, %v1606_v12 }
0x15c3   :  { %v1623_v16 = vpop.permute.xlu0 %1622 }
0x15c4   :  { %2555 = vtanh.f32 %v1626_v14  ;;  %v1627_v42 = vadd.f32 %v1623_v16, %v1607_v15 }
0x15c6   :  { %2557 = vtanh.f32 %v1627_v42 }
0x15ce   :  { %v2556_v47 = vpop.eup %2555 }
0x15cf   :  { %1632 = vrot.lane.b32.xlu1 %v2556_v47, %s2850_s12 }
0x15d0   :  { %v2558_v17 = vpop.eup %2557 }
0x15d1   :  { %1634 = vrot.lane.b32.xlu0 %v2558_v17, %s2850_s12 }
0x1641   :  { %v1633_v43 = vpop.permute.xlu1 %1632 }
0x1642   :  { %v1638_v19 = vmul.f32 %v2552_v4, %v1633_v43 }
0x1643   :  { %v1635_v46 = vpop.permute.xlu0 %1634 }
0x1644   :  { %v3300_v18 = vmul.f32 %v2554_v9, %v1635_v46 }
0x1646   :  { %v1652_v20 = vrot.slane %v3300_v18, 7 }
0x1648   :  { %v1653_v21 = vsel %vm800_vm5, %v1652_v20, %v1638_v19 }
0x1649   :  { %1654 = vrot.lane.b32.xlu0 %v1653_v21, %s2849_s30 }
0x16bb   :  { %v1655_v24 = vpop.permute.xlu0 %1654 }
0x16bc   :  { %2310 = vmatmul.mubr.msk.f32.vlgmr.msra.gmra.mrb[10].mxu1 %vm189_vm0, %v1655_v24 }
0x178f   :  { %v1724_v26 = vpop.f32.mrb[10].mxu1 }
0x1790   :  { %v1729_v27 = vrot.slane %v1724_v26, 1  ;;  %v1732_v28 = vadd.f32 %v1724_v26, %v1650_v25  ;;  %v2311_v30 = vpop.f32.mrb[11].mxu1 }
0x1792   :  { %v1733_v33 = vadd.f32 %v1729_v27, %v1651_v31  ;;  %2559 = vtanh.f32 %v1732_v28  ;;  %v2092_v36 = vmul.f32 -1.442695, %v1732_v28  ;;  %v1905_v27 = vld [vmem:[%s3437_s16 + $0x10] sm:$0xff]  ;;  %v1906_v28 = vld [vmem:[%s3437_s16 + $0x18] sm:$0xff] }
0x1793   :  { %v2422_v30 = vpack.c.bf16 %v1906_v28, %v1905_v27  ;;  %v2094_v31 = vld [vmem:[#allocation15] ss:$0 sm:$0xff] }
0x1794   :  { %2561 = vtanh.f32 %v1733_v33  ;;  %v2093_v37 = vmul.f32 -1.442695, %v1733_v33 }
0x1795   :  { %2563 = vpow2.f32 %v2092_v36 }
0x1796   :  { %2565 = vpow2.f32 %v2093_v37 }
0x179c   :  { %v2560_v34 = vpop.eup %2559 }
0x179d   :  { %1752 = vrot.lane.b32.xlu1 %v2560_v34, %s2850_s12 }
0x179e   :  { %v2562_v35 = vpop.eup %2561 }
0x179f   :  { %1754 = vrot.lane.b32.xlu0 %v2562_v35, %s2850_s12  ;;  %v2564_v38 = vpop.eup %2563 }
0x17a0   :  { %v2566_v39 = vpop.eup %2565  ;;  %v1740_v44 = vadd.f32 1.0, %v2564_v38 }
0x17a1   :  { %v1741_v45 = vadd.f32 1.0, %v2566_v39 }
0x17a2   :  { %2567 = vrcp.f32 %v1740_v44 }
0x17a3   :  { %2569 = vrcp.f32 %v1741_v45 }
0x17ac   :  { %v2568_v50 = vpop.eup %2567 }
0x17ad   :  { %v2570_v53 = vpop.eup %2569  ;;  %v1748_v56 = vmul.f32 %v2568_v50, %v1626_v14 }
0x17ae   :  { %v1749_v59 = vmul.f32 %v2570_v53, %v1627_v42 }
0x180f   :  { %v1753_v51 = vpop.permute.xlu1 %1752 }
0x1810   :  { %v1758_v52 = vmul.f32 %v2568_v50, %v1753_v51 }
0x1811   :  { %v1755_v54 = vpop.permute.xlu0 %1754 }
0x1812   :  { %1762 = vrot.lane.b32.xlu1 %v1758_v52, %s2849_s30  ;;  %v1759_v55 = vmul.f32 %v2570_v53, %v1755_v54 }
0x1814   :  { %1764 = vrot.lane.b32.xlu0 %v1759_v55, %s2849_s30 }
0x1884   :  { %v1763_v57 = vpop.permute.xlu1 %1762 }
0x1885   :  { %v1768_v58 = vadd.f32 %v1763_v57, %v1748_v56 }
0x1886   :  { %v1765_v60 = vpop.permute.xlu0 %1764 }
0x1887   :  { %2571 = vtanh.f32 %v1768_v58  ;;  %v1769_v61 = vadd.f32 %v1765_v60, %v1749_v59 }
0x1889   :  { %2573 = vtanh.f32 %v1769_v61  ;;  %v1801_v62 = vrot.slane %v1769_v61, 7 }
0x188b   :  { %v1802_v63 = vsel %vm800_vm5, %v1801_v62, %v1768_v58 }
0x1891   :  { %v2572_v0 = vpop.eup %2571 }
0x1892   :  { %1774 = vrot.lane.b32.xlu1 %v2572_v0, %s2850_s12 }
0x1893   :  { %v2574_v1 = vpop.eup %2573 }
0x1894   :  { %1776 = vrot.lane.b32.xlu0 %v2574_v1, %s2850_s12 }
0x1896   :  { %788 = vrot.lane.b32.xlu1 %v3185_v32, %s2849_s30  ;;  %v1809_v32 = vld [vmem:[%s3435_s14] sm:$0xff] }
0x1898   :  { %932 = vrot.lane.b32.xlu0 %v3205_v7, %s2849_s30  ;;  %v1811_v7 = vld [vmem:[%s3435_s14 + $0x10] sm:$0xff] }
0x189a   :  { %1074 = vrot.lane.b32.xlu1 %v3226_v49, %s2849_s30 }
0x189c   :  { %1216 = vrot.lane.b32.xlu0 %v3247_v23, %s2849_s30 }
0x189e   :  { %1358 = vrot.lane.b32.xlu1 %v3267_v3, %s2849_s30  ;;  %v1904_v3 = vld [vmem:[%s3437_s16 + $0x8] sm:$0xff] }
0x18a0   :  { %1500 = vrot.lane.b32.xlu0 %v3287_v41, %s2849_s30 }
0x18a2   :  { %1642 = vrot.lane.b32.xlu1 %v1638_v19, %s2849_s30 }
0x18a4   :  { %934 = vrot.lane.b32.xlu0 %v3203_v6, %s2849_s30 }
0x18a6   :  { %790 = vrot.lane.b32.xlu1 %v3182_v29, %s2849_s30  ;;  %v1810_v29 = vld [vmem:[%s3435_s14 + $0x8] sm:$0xff] }
0x18a7   :  { %v2410_v6 = vpack.c.bf16 %v1810_v29, %v1809_v32 }
0x18a8   :  { %1218 = vrot.lane.b32.xlu0 %v3245_v22, %s2849_s30 }
0x18a9   :  { %2411 = vmatprep.subr.bf16.mxu0 %v2410_v6 }
0x18aa   :  { %1076 = vrot.lane.b32.xlu1 %v3224_v48, %s2849_s30  ;;  %2413 = vmatpush3.bf16.msra.mxu0 %v2410_v6  ;;  %v1812_v48 = vld [vmem:[%s3435_s14 + $0x18] sm:$0xff]  ;;  %s2851_s14 = smov 96  }
0x18ab   :  { %v2414_v49 = vpack.c.bf16 %v1812_v48, %v1811_v7 }
0x18ac   :  { %1502 = vrot.lane.b32.xlu0 %v3285_v40, %s2849_s30 }
0x18ad   :  { %2415 = vmatprep.subr.bf16.mxu0 %v2414_v49 }
0x18ae   :  { %1360 = vrot.lane.b32.xlu1 %v3265_v2, %s2849_s30  ;;  %2417 = vmatpush3.bf16.msra.mxu0 %v2414_v49  ;;  %v1903_v2 = vld [vmem:[%s3437_s16] sm:$0xff]  ;;  %s2777_s16 = scalar_lea.vmem %s2027_s5, 32 }
0x18af   :  { %v2418_v41 = vpack.c.bf16 %v1904_v3, %v1903_v2  ;;  %p2778_p2 = scmp.ne.s32.totalorder %s2027_s5, %s2777_s16  ;;  %p2783_p4 = scmp.lt.s32.totalorder %s2777_s16, %s2777_s16 }
0x18b1   :  { %2419 = vmatprep.subr.bf16.mxu1 %v2418_v41  ;;  %p2784_p5 = por %p2783_p4, %p2782_p3 }
0x18b2   :  { %1644 = vrot.lane.b32.xlu1 %v3300_v18, %s2849_s30  ;;  %2421 = vmatpush3.bf16.msra.mxu1 %v2418_v41 }
0x18b3   :  { %2423 = vmatprep.subr.bf16.mxu1 %v2422_v30  ;;  %p2785_p6 = pnand %p2784_p5, %p2778_p2 }
0x18b6   :  { %2425 = vmatpush3.bf16.msra.mxu1 %v2422_v30 }
0x1904   :  { %v1775_v22 = vpop.permute.xlu1 %1774 }
0x1905   :  { %v1780_v23 = vmul.f32 %v2568_v50, %v1775_v22 }
0x1906   :  { %v1777_v40 = vpop.permute.xlu0 %1776 }
0x1907   :  { %1784 = vrot.lane.b32.xlu0 %v1780_v23, %s2849_s30  ;;  %v1781_v4 = vmul.f32 %v2570_v53, %v1777_v40 }
0x1908   :  { %v789_v5 = vpop.permute.xlu1 %788 }
0x1909   :  { %795 = vst.msk [vmem:[#allocation3] sm:$0x1] %vm794_vm6, %v789_v5  ;;  %v1792_v8 = vrot.slane %v1781_v4, 7 }
0x190a   :  { %v933_v9 = vpop.permute.xlu0 %932 }
0x190b   :  { %1786 = vrot.lane.b32.xlu0 %v1781_v4, %s2849_s30  ;;  %938 = vst.msk [vmem:[#allocation3 + $0x1] sm:$0x1] %vm794_vm6, %v933_v9  ;;  %v1793_v11 = vsel %vm800_vm5, %v1792_v8, %v1780_v23 }
0x190c   :  { %v1075_v10 = vpop.permute.xlu1 %1074  ;;  %1794 = vrot.lane.b32.xlu1 %v1793_v11, %s2849_s30 }
0x190d   :  { %1080 = vst.msk [vmem:[#allocation3 + $0x2] sm:$0x1] %vm794_vm6, %v1075_v10 }
0x190e   :  { %v1217_v12 = vpop.permute.xlu0 %1216 }
0x190f   :  { %1803 = vrot.lane.b32.xlu0 %v1802_v63, %s2851_s14  ;;  %1222 = vst.msk [vmem:[#allocation3 + $0x3] sm:$0x1] %vm794_vm6, %v1217_v12 }
0x1910   :  { %v1359_v13 = vpop.permute.xlu1 %1358 }
0x1911   :  { %1364 = vst.msk [vmem:[#allocation3 + $0x4] sm:$0x1] %vm794_vm6, %v1359_v13 }
0x1912   :  { %v1501_v14 = vpop.permute.xlu0 %1500 }
0x1913   :  { %1506 = vst.msk [vmem:[#allocation3 + $0x5] sm:$0x1] %vm794_vm6, %v1501_v14 }
0x1914   :  { %v1643_v15 = vpop.permute.xlu1 %1642 }
0x1915   :  { %1648 = vst.msk [vmem:[#allocation3 + $0x6] sm:$0x1] %vm794_vm6, %v1643_v15 }
0x1916   :  { %v935_v16 = vpop.permute.xlu0 %934 }
0x1917   :  { %939 = vst.msk [vmem:[#allocation3 + $0x9] sm:$0x1] %vm794_vm6, %v935_v16 }
0x1918   :  { %v791_v42 = vpop.permute.xlu1 %790 }
0x1919   :  { %796 = vst.msk [vmem:[#allocation3 + $0x8] sm:$0x1] %vm794_vm6, %v791_v42 }
0x191a   :  { %v1219_v47 = vpop.permute.xlu0 %1218 }
0x191b   :  { %1223 = vst.msk [vmem:[#allocation3 + $0xb] sm:$0x1] %vm794_vm6, %v1219_v47 }
0x191c   :  { %v1077_v17 = vpop.permute.xlu1 %1076 }
0x191d   :  { %1081 = vst.msk [vmem:[#allocation3 + $0xa] sm:$0x1] %vm794_vm6, %v1077_v17 }
0x191e   :  { %v1503_v43 = vpop.permute.xlu0 %1502 }
0x191f   :  { %1507 = vst.msk [vmem:[#allocation3 + $0xd] sm:$0x1] %vm794_vm6, %v1503_v43 }
0x1920   :  { %v1361_v46 = vpop.permute.xlu1 %1360 }
0x1921   :  { %1365 = vst.msk [vmem:[#allocation3 + $0xc] sm:$0x1] %vm794_vm6, %v1361_v46 }
0x1924   :  { %v1645_v18 = vpop.permute.xlu1 %1644 }
0x1925   :  { %1649 = vst.msk [vmem:[#allocation3 + $0xe] sm:$0x1] %vm794_vm6, %v1645_v18 }
0x1979   :  { %v1785_v19 = vpop.permute.xlu0 %1784 }
0x197a   :  { %1790 = vst.msk [vmem:[#allocation3 + $0x7] sm:$0x1] %vm794_vm6, %v1785_v19 }
0x197d   :  { %v1787_v20 = vpop.permute.xlu0 %1786 }
0x197e   :  { %1791 = vst.msk [vmem:[#allocation3 + $0xf] sm:$0x1] %vm794_vm6, %v1787_v20  ;;  %v1795_v21 = vpop.permute.xlu1 %1794 }
0x197f   :  { %1798 = vst.msk [vmem:[#allocation19] sm:$0x3] %vm1797_vm7, %v1795_v21 }
0x1981   :  { %v1804_v24 = vpop.permute.xlu0 %1803  ;;  %v1807_v25 = vld [vmem:[#allocation3] sm:$0xff] }
0x1982   :  { %2320 = vmatprep.mubr.msk.f32.mxu0 %vm189_vm0, %v1807_v25  ;;  %1806 = vst.msk [vmem:[#allocation20] sm:$0x3] %vm1797_vm7, %v1804_v24 }
0x1985   :  { %v1808_v26 = vld [vmem:[#allocation3 + $0x8] sm:$0xff] }
0x1986   :  { %2321 = vmatmul.mubr.msk.f32.vlgmr.msra.gmra.mrb[12].mxu0 %vm189_vm0, %v1808_v26 }
0x1a59   :  { %v2322_v33 = vpop.f32.mrb[12].mxu0 }
0x1a5a   :  { %v1898_v34 = vadd.f32 %v2322_v33, %v2094_v31  ;;  %v1892_v35 = vpop.f32.mrb[13].mxu0 }
0x1a5b   :  { %v1893_v36 = vadd.f32 %v2094_v31, %v1892_v35 }
0x1a5c   :  { %v1902_v38 = vmax.f32 %v1898_v34, 0.0 }
0x1a5d   :  { %v1901_v37 = vmax.f32 %v1893_v36, 0.0 }
0x1a5f   :  { %2331 = vmatprep.mubr.msk.f32.mxu1 %vm189_vm0, %v1901_v37 }
0x1a60   :  { %2332 = vmatmul.mubr.msk.f32.vlgmr.msra.gmra.mrb[12].mxu1 %vm189_vm0, %v1902_v38 }
0x1a61   :  { %2788 = shalt.err (!%p2785_p6)
}
0x1a62   :  { %s2789_s2 = scalar_lea.hbm %s3442_s21, 32 }
0x1a63   :  { %p2790_p7 = scmp.ne.s32.totalorder %s3442_s21, %s2789_s2  ;;  %p2793_p8 = scmp.lt.u32.totalorder %s2789_s2, %s3442_s21 }
0x1a65   :  { %p2795_p9 = pnand %p2793_p8, %p2790_p7 }
0x1a67   :  { %2798 = shalt.err (!%p2795_p9)
}
0x1a68   :  { %2029 = dma.vmem_to_hbm [thread:$0]  %s2027_s5, 32, %s3442_s21, [#allocation6]  }
0x1a69   :  { %s2799_s25 = scalar_lea.vmem %s2037_s0, 32  ;;  %p2804_p11 = scmp.lt.s32.totalorder %s2037_s0, %s2037_s0 }
0x1a6a   :  { %p2800_p10 = scmp.ne.s32.totalorder %s2037_s0, %s2799_s25  ;;  %p2805_p12 = scmp.lt.s32.totalorder %s2799_s25, %s2799_s25 }
0x1a6c   :  { %p2806_p13 = por %p2805_p12, %p2804_p11 }
0x1a6e   :  { %p2807_p0 = pnand %p2806_p13, %p2800_p10 }
0x1a70   :  { %2810 = shalt.err (!%p2807_p0)
}
0x1a71   :  { %s2811_s29 = scalar_lea.hbm %s3443_s22, 32 }
0x1a72   :  { %p2812_p1 = scmp.ne.s32.totalorder %s3443_s22, %s2811_s29  ;;  %p2815_p2 = scmp.lt.u32.totalorder %s2811_s29, %s3443_s22 }
0x1a74   :  { %p2817_p3 = pnand %p2815_p2, %p2812_p1 }
0x1a76   :  { %2820 = shalt.err (!%p2817_p3)
}
0x1a77   :  { %2039 = dma.vmem_to_hbm [thread:$0]  %s2037_s0, 32, %s3443_s22, [#allocation21]   ;;  %v2097_v39 = vld [vmem:[#allocation16] ss:$0 sm:$0xff]  ;;  %v2100_v52 = vld [vmem:[%s3439_s18] ss:$0 sm:$0xff] }
0x1a78   :  { %v2101_v54 = vld [vmem:[#allocation18] ss:$0 sm:$0xff]  ;;  %vm2015_vm8 = vcmask 15360  }
0x1b33   :  { %v2333_v44 = vpop.f32.mrb[12].mxu1 }
0x1b34   :  { %v1992_v45 = vadd.f32 %v2333_v44, %v2097_v39  ;;  %v1986_v50 = vpop.f32.mrb[13].mxu1 }
0x1b35   :  { %v1987_v51 = vadd.f32 %v2097_v39, %v1986_v50 }
0x1b36   :  { %2575 = vtanh.f32 %v1992_v45 }
0x1b37   :  { %2577 = vtanh.f32 %v1987_v51 }
0x1b40   :  { %v2576_v53 = vpop.eup %2575 }
0x1b41   :  { %v2578_v55 = vpop.eup %2577  ;;  %v2005_v56 = vmul.f32 %v2576_v53, %v2100_v52 }
0x1b42   :  { %v2004_v57 = vmul.f32 %v2578_v55, %v2100_v52 }
0x1b43   :  { %v2014_v58 = vadd.f32 %v2101_v54, %v2005_v56 }
0x1b44   :  { %v2013_v59 = vadd.f32 %v2101_v54, %v2004_v57 }
0x1b45   :  { %2017 = vst.msk [vmem:[%s3441_s20 + $0x8] sm:$0xff] %vm2015_vm8, %v2014_v58 }
0x1b46   :  { %2016 = vst.msk [vmem:[%s3441_s20] sm:$0xff] %vm2015_vm8, %v2013_v59 }
0x1b47   :  { %2831 = dma.done.wait [#allocation6], 32  }
0x1b48   :  { %2832 = vsyncadd [#allocation6], 4294967264 }
0x1b49   :  { %2833 = dma.done.wait [#allocation21], 32  }
0x1b4a   :  { %2834 = vsyncadd [#allocation21], 4294967264 }
0x1b4b   :  { %2048 = vsyncpa [#allocation5], 1 }
0x1b4c   :  { %2049 = vsyncpa [#allocation8], 1 }
0x1b4d   :  { %2050 = vsyncpa [#allocation11], 1 }
0x1b4e   :  { %2051 = vsyncpa [#allocation14], 1 }
0x1b4f   :  { %2052 = vsyncpa [#allocation17], 1 }
0x1b50   :  { %2053 = vsyncpa [#allocation6], 1 }
0x1b51   :  { %2054 = vsyncpa [#allocation21], 1 }

</bundles_post_ra>
